<compile_context>
chip_gen: v7x
topology: tpu7x:2x2x1
jax: 0.10.0
libtpu: 0.0.40
codegen_flags: <defaults>
</compile_context>

<pallas_src>
import math
import functools

import jax
import jax.numpy as jnp
from jax.experimental import pallas as pl
from jax.experimental.pallas import tpu as pltpu


# ------------------------------------------------------------------ kernel body

def _mha_body(q_ref, k_ref, v_ref,
              wq_ref, bq_ref, wk_ref, bk_ref, wv_ref, bv_ref,
              wf_ref, bf_ref,
              out_ref, attn_ref,
              *, h, d_k, scale):
    f32 = jnp.float32
    bf16 = jnp.bfloat16
    Bt, S, Din = q_ref.shape
    Dm = h * d_k
    M = Bt * S

    def project(x_ref, w_ref, b_ref):
        # One lane-dense (M, Din) @ (Din, Dm) MXU call: bf16 operands, f32 accumulation.
        x2 = x_ref[...].reshape(M, Din)
        y = jnp.dot(x2, w_ref[...], preferred_element_type=f32)
        return y + b_ref[...].astype(f32)                 # (M, Dm) f32

    def to_heads(x_f32):
        # (M, Dm) f32 -> (h*Bt, S, d_k) bf16 with head-major combined batch index
        # (head * Bt + b), so all downstream matmuls are a single batched dot.
        x3 = x_f32.astype(bf16).reshape(M, h, d_k)
        return pltpu.einshape("mhd->hmd", x3).reshape(h * Bt, S, d_k)

    # 1/sqrt(d_k) folded into Q (S*Dm multiplies instead of h*S^2).
    q_heads = to_heads(project(q_ref, wq_ref, bq_ref) * scale)
    k_heads = to_heads(project(k_ref, wk_ref, bk_ref))
    v_heads = to_heads(project(v_ref, wv_ref, bv_ref))

    # Scaled dot-product attention, all (head, batch) pairs in one batched MXU call.
    # Contraction on the last dims of both operands — no explicit K transpose.
    scores = jnp.einsum('bqd,bkd->bqk', q_heads, k_heads,
                        preferred_element_type=f32)       # (h*Bt, S, S) f32

    # Numerically stable softmax, f32 math; reciprocal on the EUP slot.
    m = jnp.max(scores, axis=-1, keepdims=True)
    e = jnp.exp(scores - m)
    p = e * pl.reciprocal(jnp.sum(e, axis=-1, keepdims=True), approx=True)

    if attn_ref is not None:
        # attn output block is laid out (h, Bt, S, S); transposed to (B, h, S, S) outside.
        attn_ref[...] = p.reshape(h, Bt, S, S).astype(attn_ref.dtype)

    ctx = jnp.einsum('bqk,bkd->bqd', p.astype(bf16), v_heads,
                     preferred_element_type=f32)          # (h*Bt, S, d_k) f32

    # Back to (M, Dm) for the final projection (single MXU call), then store.
    ctx2 = pltpu.einshape("hmd->mhd",
                          ctx.astype(bf16).reshape(h, M, d_k)).reshape(M, Dm)
    y = jnp.dot(ctx2, wf_ref[...], preferred_element_type=f32) + bf_ref[...].astype(f32)
    out_ref[...] = y.reshape(Bt, S, Dm).astype(out_ref.dtype)


def _mha_kernel_with_attn(q_ref, k_ref, v_ref, wq_ref, bq_ref, wk_ref, bk_ref,
                          wv_ref, bv_ref, wf_ref, bf_ref, out_ref, attn_ref,
                          *, h, d_k, scale):
    _mha_body(q_ref, k_ref, v_ref, wq_ref, bq_ref, wk_ref, bk_ref,
              wv_ref, bv_ref, wf_ref, bf_ref, out_ref, attn_ref,
              h=h, d_k=d_k, scale=scale)


def _mha_kernel_no_attn(q_ref, k_ref, v_ref, wq_ref, bq_ref, wk_ref, bk_ref,
                        wv_ref, bv_ref, wf_ref, bf_ref, out_ref,
                        *, h, d_k, scale):
    _mha_body(q_ref, k_ref, v_ref, wq_ref, bq_ref, wk_ref, bk_ref,
              wv_ref, bv_ref, wf_ref, bf_ref, out_ref, None,
              h=h, d_k=d_k, scale=scale)


# ------------------------------------------------------------------ wrapper

def _default_batch_block(B, S, Din, Dm, h, return_attn, attn_bytes,
                         budget_bytes=24 * 1024 * 1024):
    """Largest divisor of B whose per-step VMEM estimate stays under `budget_bytes`."""
    weights = 2 * (3 * Din * Dm + Dm * Dm) * 2 + 4 * 4 * Dm   # bf16 weights (x2 buffers) + biases

    def estimate(bt):
        io = 2 * (3 * bt * S * Din * 2 + bt * S * Dm * 4)     # double-buffered in/out blocks
        if return_attn:
            io += 2 * h * bt * S * S * attn_bytes
        tmp = 4 * bt * S * Dm * 4 + 3 * h * bt * S * S * 4    # f32 activations / scores / probs
        return weights + io + tmp

    best = 1
    for cand in range(1, B + 1):
        if B % cand == 0 and estimate(cand) <= budget_bytes:
            best = cand
    return best


def multi_headed_attention(q, k, v, params, *, h, d_k,
                           return_attn=True, attn_dtype=jnp.float32,
                           out_dtype=jnp.float32, batch_block=None):
    """Fused Q/K/V projections + multi-head attention + output projection (mask=None, dropout=0)."""
    B, S, Din = q.shape
    Dm = h * d_k
    wq, bq, wk, bk, wv, bv, wf, bf = params

    # bf16 operands feed the MXU at full rate and halve HBM/VMEM traffic for inputs & weights;
    # accumulation and softmax stay f32 inside the kernel.
    q, k, v = (x.astype(jnp.bfloat16) for x in (q, k, v))
    wq, wk, wv, wf = (w.astype(jnp.bfloat16) for w in (wq, wk, wv, wf))
    bq, bk, bv, bf = (b.astype(jnp.float32) for b in (bq, bk, bv, bf))

    if batch_block is None:
        batch_block = _default_batch_block(B, S, Din, Dm, h, return_attn,
                                           jnp.dtype(attn_dtype).itemsize)
    assert B % batch_block == 0, "batch_block must divide the batch size"
    grid = (B // batch_block,)
    scale = 1.0 / math.sqrt(d_k)

    x_spec = pl.BlockSpec((batch_block, S, Din), lambda b: (b, 0, 0))
    w_in_spec = pl.BlockSpec((Din, Dm), lambda b: (0, 0))
    w_f_spec = pl.BlockSpec((Dm, Dm), lambda b: (0, 0))
    b_spec = pl.BlockSpec((1, Dm), lambda b: (0, 0))
    out_spec = pl.BlockSpec((batch_block, S, Dm), lambda b: (b, 0, 0))

    in_specs = [x_spec, x_spec, x_spec,
                w_in_spec, b_spec, w_in_spec, b_spec, w_in_spec, b_spec,
                w_f_spec, b_spec]
    args = (q, k, v, wq, bq, wk, bk, wv, bv, wf, bf)

    compiler_params = pltpu.CompilerParams(
        dimension_semantics=("parallel",),
        vmem_limit_bytes=64 * 1024 * 1024)

    if return_attn:
        kernel = functools.partial(_mha_kernel_with_attn, h=h, d_k=d_k, scale=scale)
        out, attn_hb = pl.pallas_call(
            kernel,
            out_shape=(jax.ShapeDtypeStruct((B, S, Dm), out_dtype),
                       jax.ShapeDtypeStruct((h, B, S, S), attn_dtype)),
            grid=grid,
            in_specs=in_specs,
            out_specs=(out_spec,
                       pl.BlockSpec((h, batch_block, S, S), lambda b: (0, b, 0, 0))),
            compiler_params=compiler_params,
        )(*args)
        # (h, B, S, S) -> (B, h, S, S): cheap layout fix outside the kernel.
        attn = jnp.transpose(attn_hb, (1, 0, 2, 3))
        return out, attn

    kernel = functools.partial(_mha_kernel_no_attn, h=h, d_k=d_k, scale=scale)
    out = pl.pallas_call(
        kernel,
        out_shape=jax.ShapeDtypeStruct((B, S, Dm), out_dtype),
        grid=grid,
        in_specs=in_specs,
        out_specs=out_spec,
        compiler_params=compiler_params,
    )(*args)
    return out, None


# ------------------------------------------------------------------ reference & self-test

def reference_mha(q, k, v, params, *, h, d_k):
    """Pure-JAX f32 reference mirroring the PyTorch forward (mask=None, dropout=0)."""
    wq, bq, wk, bk, wv, bv, wf, bf = params
    B, S, _ = q.shape

    def proj(x, w, b):
        y = x @ w + b[0]
        return y.reshape(B, S, h, d_k).transpose(0, 2, 1, 3)   # (B, h, S, d_k)

    Q, K, V = proj(q, wq, bq), proj(k, wk, bk), proj(v, wv, bv)
    scores = jnp.einsum('bhqd,bhkd->bhqk', Q, K) / math.sqrt(d_k)
    p = jax.nn.softmax(scores, axis=-1)
    x = jnp.einsum('bhqk,bhkd->bhqd', p, V)
    x = x.transpose(0, 2, 1, 3).reshape(B, S, h * d_k)
    return x @ wf + bf[0], p


if __name__ == "__main__":
    B, S, word_dim = 2, 8, 32
    h, d_k = 4, 8
    d_model = h * d_k

    key = jax.random.PRNGKey(0)
    keys = jax.random.split(key, 12)

    q = jax.random.normal(keys[0], (B, S, word_dim), dtype=jnp.float32)
    k = jax.random.normal(keys[1], (B, S, word_dim), dtype=jnp.float32)
    v = jax.random.normal(keys[2], (B, S, word_dim), dtype=jnp.float32)

    def init_w(key, shape):
        return 0.1 * jax.random.normal(key, shape, dtype=jnp.float32)

    params = (
        init_w(keys[3], (word_dim, d_model)), init_w(keys[4], (1, d_model)),   # linears[0] (Q)
        init_w(keys[5], (word_dim, d_model)), init_w(keys[6], (1, d_model)),   # linears[1] (K)
        init_w(keys[7], (word_dim, d_model)), init_w(keys[8], (1, d_model)),   # linears[2] (V)
        init_w(keys[9], (d_model, d_model)), init_w(keys[10], (1, d_model)),   # final
    )

    ref_out, ref_attn = reference_mha(q, k, v, params, h=h, d_k=d_k)

    # Full path (attention probabilities returned, like the PyTorch module).
    out, attn = multi_headed_attention(q, k, v, params, h=h, d_k=d_k, return_attn=True)
    out = jax.block_until_ready(out)
    attn = jax.block_until_ready(attn)
    assert out.shape == (B, S, d_model) and attn.shape == (B, h, S, S)
    # bf16 MXU operands + approx reciprocal -> relaxed tolerances vs the pure-f32 reference.
    assert jnp.allclose(out, ref_out, atol=5e-2, rtol=5e-2)
    assert jnp.allclose(attn, ref_attn, atol=5e-2, rtol=5e-2)

    # Fast path (skips the O(h*S^2) attention-probability HBM write).
    out2, attn2 = multi_headed_attention(q, k, v, params, h=h, d_k=d_k, return_attn=False)
    out2 = jax.block_until_ready(out2)
    assert attn2 is None
    assert jnp.allclose(out2, ref_out, atol=5e-2, rtol=5e-2)

    print("KERNEL_OK")
</pallas_src>

<mosaic_0001>
module attributes {stable_mosaic.version = 11 : i64} {
  func.func @_mha_kernel_with_attn(%arg0: i32, %arg1: memref<2x8x32xbf16, #tpu.memory_space<vmem>>, %arg2: memref<2x8x32xbf16, #tpu.memory_space<vmem>>, %arg3: memref<2x8x32xbf16, #tpu.memory_space<vmem>>, %arg4: memref<32x32xbf16, #tpu.memory_space<vmem>>, %arg5: memref<1x32xf32, #tpu.memory_space<vmem>>, %arg6: memref<32x32xbf16, #tpu.memory_space<vmem>>, %arg7: memref<1x32xf32, #tpu.memory_space<vmem>>, %arg8: memref<32x32xbf16, #tpu.memory_space<vmem>>, %arg9: memref<1x32xf32, #tpu.memory_space<vmem>>, %arg10: memref<32x32xbf16, #tpu.memory_space<vmem>>, %arg11: memref<1x32xf32, #tpu.memory_space<vmem>>, %arg12: memref<2x8x32xf32, #tpu.memory_space<vmem>>, %arg13: memref<4x2x8x8xf32, #tpu.memory_space<vmem>>) attributes {dimension_semantics = [#tpu.dimension_semantics<parallel>], iteration_bounds = array<i64: 1>, scalar_prefetch = 0 : i64, scratch_operands = 0 : i64, tpu.core_type = #tpu.core_type<tc>, window_params = [{transform_indices = @transform_0, window_bounds = array<i64: 2, 8, 32>}, {transform_indices = @transform_1, window_bounds = array<i64: 2, 8, 32>}, {transform_indices = @transform_2, window_bounds = array<i64: 2, 8, 32>}, {pipeline_mode = #tpu.pipeline_mode<synchronous>, transform_indices = @transform_3, window_bounds = array<i64: 32, 32>}, {pipeline_mode = #tpu.pipeline_mode<synchronous>, transform_indices = @transform_4, window_bounds = array<i64: 1, 32>}, {pipeline_mode = #tpu.pipeline_mode<synchronous>, transform_indices = @transform_5, window_bounds = array<i64: 32, 32>}, {pipeline_mode = #tpu.pipeline_mode<synchronous>, transform_indices = @transform_6, window_bounds = array<i64: 1, 32>}, {pipeline_mode = #tpu.pipeline_mode<synchronous>, transform_indices = @transform_7, window_bounds = array<i64: 32, 32>}, {pipeline_mode = #tpu.pipeline_mode<synchronous>, transform_indices = @transform_8, window_bounds = array<i64: 1, 32>}, {pipeline_mode = #tpu.pipeline_mode<synchronous>, transform_indices = @transform_9, window_bounds = array<i64: 32, 32>}, {pipeline_mode = #tpu.pipeline_mode<synchronous>, transform_indices = @transform_10, window_bounds = array<i64: 1, 32>}, {transform_indices = @transform_11, window_bounds = array<i64: 2, 8, 32>}, {transform_indices = @transform_12, window_bounds = array<i64: 4, 2, 8, 8>}]} {
    %c0 = arith.constant 0 : index
    %c0_0 = arith.constant 0 : index
    %c0_1 = arith.constant 0 : index
    %0 = vector.load %arg1[%c0, %c0_0, %c0_1] : memref<2x8x32xbf16, #tpu.memory_space<vmem>>, vector<2x8x32xbf16>
    %1 = vector.shape_cast %0 : vector<2x8x32xbf16> to vector<16x32xbf16>
    %c0_2 = arith.constant 0 : index
    %c0_3 = arith.constant 0 : index
    %2 = vector.load %arg4[%c0_2, %c0_3] : memref<32x32xbf16, #tpu.memory_space<vmem>>, vector<32x32xbf16>
    %cst = arith.constant dense<0.000000e+00> : vector<16x32xf32>
    %3 = tpu.matmul %1, %2, %cst {dimension_numbers = #tpu.dot_dimension_numbers<[1], [0], [0], [1], [0, 0, 1, 1], [], []>} : vector<16x32xbf16>, vector<32x32xbf16>, vector<16x32xf32> -> vector<16x32xf32>
    %c0_4 = arith.constant 0 : index
    %c0_5 = arith.constant 0 : index
    %4 = vector.load %arg5[%c0_4, %c0_5] : memref<1x32xf32, #tpu.memory_space<vmem>>, vector<1x32xf32>
    %5 = vector.broadcast %4 : vector<1x32xf32> to vector<16x32xf32>
    %6 = arith.addf %3, %5 : vector<16x32xf32>
    %cst_6 = arith.constant 0.353553385 : f32
    %7 = vector.broadcast %cst_6 : f32 to vector<16x32xf32>
    %8 = arith.mulf %6, %7 : vector<16x32xf32>
    %9 = arith.truncf %8 : vector<16x32xf32> to vector<16x32xbf16>
    %10 = vector.shape_cast %9 : vector<16x32xbf16> to vector<16x4x8xbf16>
    %11 = tpu.transpose %10, [1, 0, 2] : vector<16x4x8xbf16> -> vector<4x16x8xbf16>
    %12 = vector.shape_cast %11 : vector<4x16x8xbf16> to vector<8x8x8xbf16>
    %c0_7 = arith.constant 0 : index
    %c0_8 = arith.constant 0 : index
    %c0_9 = arith.constant 0 : index
    %13 = vector.load %arg2[%c0_7, %c0_8, %c0_9] : memref<2x8x32xbf16, #tpu.memory_space<vmem>>, vector<2x8x32xbf16>
    %14 = vector.shape_cast %13 : vector<2x8x32xbf16> to vector<16x32xbf16>
    %c0_10 = arith.constant 0 : index
    %c0_11 = arith.constant 0 : index
    %15 = vector.load %arg6[%c0_10, %c0_11] : memref<32x32xbf16, #tpu.memory_space<vmem>>, vector<32x32xbf16>
    %cst_12 = arith.constant dense<0.000000e+00> : vector<16x32xf32>
    %16 = tpu.matmul %14, %15, %cst_12 {dimension_numbers = #tpu.dot_dimension_numbers<[1], [0], [0], [1], [0, 0, 1, 1], [], []>} : vector<16x32xbf16>, vector<32x32xbf16>, vector<16x32xf32> -> vector<16x32xf32>
    %c0_13 = arith.constant 0 : index
    %c0_14 = arith.constant 0 : index
    %17 = vector.load %arg7[%c0_13, %c0_14] : memref<1x32xf32, #tpu.memory_space<vmem>>, vector<1x32xf32>
    %18 = vector.broadcast %17 : vector<1x32xf32> to vector<16x32xf32>
    %19 = arith.addf %16, %18 : vector<16x32xf32>
    %20 = arith.truncf %19 : vector<16x32xf32> to vector<16x32xbf16>
    %21 = vector.shape_cast %20 : vector<16x32xbf16> to vector<16x4x8xbf16>
    %22 = tpu.transpose %21, [1, 0, 2] : vector<16x4x8xbf16> -> vector<4x16x8xbf16>
    %23 = vector.shape_cast %22 : vector<4x16x8xbf16> to vector<8x8x8xbf16>
    %c0_15 = arith.constant 0 : index
    %c0_16 = arith.constant 0 : index
    %c0_17 = arith.constant 0 : index
    %24 = vector.load %arg3[%c0_15, %c0_16, %c0_17] : memref<2x8x32xbf16, #tpu.memory_space<vmem>>, vector<2x8x32xbf16>
    %25 = vector.shape_cast %24 : vector<2x8x32xbf16> to vector<16x32xbf16>
    %c0_18 = arith.constant 0 : index
    %c0_19 = arith.constant 0 : index
    %26 = vector.load %arg8[%c0_18, %c0_19] : memref<32x32xbf16, #tpu.memory_space<vmem>>, vector<32x32xbf16>
    %cst_20 = arith.constant dense<0.000000e+00> : vector<16x32xf32>
    %27 = tpu.matmul %25, %26, %cst_20 {dimension_numbers = #tpu.dot_dimension_numbers<[1], [0], [0], [1], [0, 0, 1, 1], [], []>} : vector<16x32xbf16>, vector<32x32xbf16>, vector<16x32xf32> -> vector<16x32xf32>
    %c0_21 = arith.constant 0 : index
    %c0_22 = arith.constant 0 : index
    %28 = vector.load %arg9[%c0_21, %c0_22] : memref<1x32xf32, #tpu.memory_space<vmem>>, vector<1x32xf32>
    %29 = vector.broadcast %28 : vector<1x32xf32> to vector<16x32xf32>
    %30 = arith.addf %27, %29 : vector<16x32xf32>
    %31 = arith.truncf %30 : vector<16x32xf32> to vector<16x32xbf16>
    %32 = vector.shape_cast %31 : vector<16x32xbf16> to vector<16x4x8xbf16>
    %33 = tpu.transpose %32, [1, 0, 2] : vector<16x4x8xbf16> -> vector<4x16x8xbf16>
    %34 = vector.shape_cast %33 : vector<4x16x8xbf16> to vector<8x8x8xbf16>
    "tpu.trace_start"() <{level = 10 : i32, message = "bqd,bkd->bqk"}> : () -> ()
    %cst_23 = arith.constant dense<0.000000e+00> : vector<8x8x8xf32>
    %35 = tpu.matmul %12, %23, %cst_23 {dimension_numbers = #tpu.dot_dimension_numbers<[2], [2], [1], [1], [0, 0, 0, 1, 1, 1], [0], [0]>} : vector<8x8x8xbf16>, vector<8x8x8xbf16>, vector<8x8x8xf32> -> vector<8x8x8xf32>
    "tpu.trace_stop"() : () -> ()
    %cst_24 = arith.constant dense<0xFF800000> : vector<8x8xf32>
    %36 = vector.multi_reduction <maximumf>, %35, %cst_24 [2] : vector<8x8x8xf32> to vector<8x8xf32>
    %37 = vector.shape_cast %36 : vector<8x8xf32> to vector<8x8x1xf32>
    %38 = vector.broadcast %37 : vector<8x8x1xf32> to vector<8x8x8xf32>
    %39 = arith.subf %35, %38 : vector<8x8x8xf32>
    %40 = math.exp %39 : vector<8x8x8xf32>
    %cst_25 = arith.constant dense<0.000000e+00> : vector<8x8xf32>
    %41 = vector.multi_reduction <add>, %40, %cst_25 [2] : vector<8x8x8xf32> to vector<8x8xf32>
    %42 = vector.shape_cast %41 : vector<8x8xf32> to vector<8x8x1xf32>
    %43 = tpu.reciprocal %42 {approx = true} : vector<8x8x1xf32> -> vector<8x8x1xf32>
    %44 = vector.broadcast %43 : vector<8x8x1xf32> to vector<8x8x8xf32>
    %45 = arith.mulf %40, %44 : vector<8x8x8xf32>
    %46 = vector.shape_cast %45 : vector<8x8x8xf32> to vector<4x2x8x8xf32>
    %c0_26 = arith.constant 0 : index
    %c0_27 = arith.constant 0 : index
    %c0_28 = arith.constant 0 : index
    %c0_29 = arith.constant 0 : index
    %47 = vector.load %arg13[%c0_26, %c0_27, %c0_28, %c0_29] : memref<4x2x8x8xf32, #tpu.memory_space<vmem>>, vector<4x2x8x8xf32>
    tpu.vector_store %arg13[%c0_26, %c0_27, %c0_28, %c0_29], %46 {strides = array<i32>} : memref<4x2x8x8xf32, #tpu.memory_space<vmem>>, vector<4x2x8x8xf32>,
    %48 = arith.truncf %45 : vector<8x8x8xf32> to vector<8x8x8xbf16>
    "tpu.trace_start"() <{level = 10 : i32, message = "bqk,bkd->bqd"}> : () -> ()
    %cst_30 = arith.constant dense<0.000000e+00> : vector<8x8x8xf32>
    %49 = tpu.matmul %48, %34, %cst_30 {dimension_numbers = #tpu.dot_dimension_numbers<[2], [1], [1], [2], [0, 0, 0, 1, 1, 2], [0], [0]>} : vector<8x8x8xbf16>, vector<8x8x8xbf16>, vector<8x8x8xf32> -> vector<8x8x8xf32>
    "tpu.trace_stop"() : () -> ()
    %50 = arith.truncf %49 : vector<8x8x8xf32> to vector<8x8x8xbf16>
    %51 = vector.shape_cast %50 : vector<8x8x8xbf16> to vector<4x16x8xbf16>
    %52 = tpu.transpose %51, [1, 0, 2] : vector<4x16x8xbf16> -> vector<16x4x8xbf16>
    %53 = vector.shape_cast %52 : vector<16x4x8xbf16> to vector<16x32xbf16>
    %c0_31 = arith.constant 0 : index
    %c0_32 = arith.constant 0 : index
    %54 = vector.load %arg10[%c0_31, %c0_32] : memref<32x32xbf16, #tpu.memory_space<vmem>>, vector<32x32xbf16>
    %cst_33 = arith.constant dense<0.000000e+00> : vector<16x32xf32>
    %55 = tpu.matmul %53, %54, %cst_33 {dimension_numbers = #tpu.dot_dimension_numbers<[1], [0], [0], [1], [0, 0, 1, 1], [], []>} : vector<16x32xbf16>, vector<32x32xbf16>, vector<16x32xf32> -> vector<16x32xf32>
    %c0_34 = arith.constant 0 : index
    %c0_35 = arith.constant 0 : index
    %56 = vector.load %arg11[%c0_34, %c0_35] : memref<1x32xf32, #tpu.memory_space<vmem>>, vector<1x32xf32>
    %57 = vector.broadcast %56 : vector<1x32xf32> to vector<16x32xf32>
    %58 = arith.addf %55, %57 : vector<16x32xf32>
    %59 = vector.shape_cast %58 : vector<16x32xf32> to vector<2x8x32xf32>
    %c0_36 = arith.constant 0 : index
    %c0_37 = arith.constant 0 : index
    %c0_38 = arith.constant 0 : index
    %60 = vector.load %arg12[%c0_36, %c0_37, %c0_38] : memref<2x8x32xf32, #tpu.memory_space<vmem>>, vector<2x8x32xf32>
    tpu.vector_store %arg12[%c0_36, %c0_37, %c0_38], %59 {strides = array<i32>} : memref<2x8x32xf32, #tpu.memory_space<vmem>>, vector<2x8x32xf32>,
    return
  }
  func.func @transform_0(%arg0: i32) -> (i32, i32, i32) {
    %c0_i32 = arith.constant 0 : i32
    %c0_i32_0 = arith.constant 0 : i32
    %c0_i32_1 = arith.constant 0 : i32
    return %arg0, %c0_i32, %c0_i32_0 : i32, i32, i32
  }
  func.func @transform_1(%arg0: i32) -> (i32, i32, i32) {
    %c0_i32 = arith.constant 0 : i32
    %c0_i32_0 = arith.constant 0 : i32
    %c0_i32_1 = arith.constant 0 : i32
    return %arg0, %c0_i32, %c0_i32_0 : i32, i32, i32
  }
  func.func @transform_2(%arg0: i32) -> (i32, i32, i32) {
    %c0_i32 = arith.constant 0 : i32
    %c0_i32_0 = arith.constant 0 : i32
    %c0_i32_1 = arith.constant 0 : i32
    return %arg0, %c0_i32, %c0_i32_0 : i32, i32, i32
  }
  func.func @transform_3(%arg0: i32) -> (i32, i32) {
    %c0_i32 = arith.constant 0 : i32
    %c0_i32_0 = arith.constant 0 : i32
    %c0_i32_1 = arith.constant 0 : i32
    return %c0_i32, %c0_i32_0 : i32, i32
  }
  func.func @transform_4(%arg0: i32) -> (i32, i32) {
    %c0_i32 = arith.constant 0 : i32
    %c0_i32_0 = arith.constant 0 : i32
    %c0_i32_1 = arith.constant 0 : i32
    return %c0_i32, %c0_i32_0 : i32, i32
  }
  func.func @transform_5(%arg0: i32) -> (i32, i32) {
    %c0_i32 = arith.constant 0 : i32
    %c0_i32_0 = arith.constant 0 : i32
    %c0_i32_1 = arith.constant 0 : i32
    return %c0_i32, %c0_i32_0 : i32, i32
  }
  func.func @transform_6(%arg0: i32) -> (i32, i32) {
    %c0_i32 = arith.constant 0 : i32
    %c0_i32_0 = arith.constant 0 : i32
    %c0_i32_1 = arith.constant 0 : i32
    return %c0_i32, %c0_i32_0 : i32, i32
  }
  func.func @transform_7(%arg0: i32) -> (i32, i32) {
    %c0_i32 = arith.constant 0 : i32
    %c0_i32_0 = arith.constant 0 : i32
    %c0_i32_1 = arith.constant 0 : i32
    return %c0_i32, %c0_i32_0 : i32, i32
  }
  func.func @transform_8(%arg0: i32) -> (i32, i32) {
    %c0_i32 = arith.constant 0 : i32
    %c0_i32_0 = arith.constant 0 : i32
    %c0_i32_1 = arith.constant 0 : i32
    return %c0_i32, %c0_i32_0 : i32, i32
  }
  func.func @transform_9(%arg0: i32) -> (i32, i32) {
    %c0_i32 = arith.constant 0 : i32
    %c0_i32_0 = arith.constant 0 : i32
    %c0_i32_1 = arith.constant 0 : i32
    return %c0_i32, %c0_i32_0 : i32, i32
  }
  func.func @transform_10(%arg0: i32) -> (i32, i32) {
    %c0_i32 = arith.constant 0 : i32
    %c0_i32_0 = arith.constant 0 : i32
    %c0_i32_1 = arith.constant 0 : i32
    return %c0_i32, %c0_i32_0 : i32, i32
  }
  func.func @transform_11(%arg0: i32) -> (i32, i32, i32) {
    %c0_i32 = arith.constant 0 : i32
    %c0_i32_0 = arith.constant 0 : i32
    %c0_i32_1 = arith.constant 0 : i32
    return %arg0, %c0_i32, %c0_i32_0 : i32, i32, i32
  }
  func.func @transform_12(%arg0: i32) -> (i32, i32, i32, i32) {
    %c0_i32 = arith.constant 0 : i32
    %c0_i32_0 = arith.constant 0 : i32
    %c0_i32_1 = arith.constant 0 : i32
    %c0_i32_2 = arith.constant 0 : i32
    return %c0_i32, %arg0, %c0_i32_0, %c0_i32_1 : i32, i32, i32, i32
  }
}

</mosaic_0001>

<bundles_post_ra>
// kernel: tpu_custom_call.1
= control target key start
LH: loop header
LB: loop body
LE: loop exit
PB: predicated region body
PF: predicated region fallthrough
CT: control target
= control target key end

     0   :  { %18 = vsyncpa [#allocation3], 0  ;;  %s3772_s0 = inlined_call_operand.hbm [shape: bf16[2,8,32], index: 0, kind: input, shape index: {}]   ;;  %s3773_s1 = inlined_call_operand.hbm [shape: bf16[2,8,32], index: 1, kind: input, shape index: {}]   ;;  %s3774_s2 = inlined_call_operand.hbm [shape: bf16[2,8,32], index: 2, kind: input, shape index: {}]   ;;  %s3775_s3 = inlined_call_operand.hbm [shape: bf16[32,32], index: 3, kind: input, shape index: {}]   ;;  %s3776_s4 = inlined_call_operand.hbm [shape: f32[1,32], index: 4, kind: input, shape index: {}]   ;;  %s3777_s5 = inlined_call_operand.hbm [shape: bf16[32,32], index: 5, kind: input, shape index: {}]   ;;  %s3778_s6 = inlined_call_operand.hbm [shape: f32[1,32], index: 6, kind: input, shape index: {}]   ;;  %s3779_s7 = inlined_call_operand.hbm [shape: bf16[32,32], index: 7, kind: input, shape index: {}]   ;;  %s3780_s8 = inlined_call_operand.hbm [shape: f32[1,32], index: 8, kind: input, shape index: {}]   ;;  %s3781_s9 = inlined_call_operand.hbm [shape: bf16[32,32], index: 9, kind: input, shape index: {}]   ;;  %s3782_s10 = inlined_call_operand.hbm [shape: f32[1,32], index: 10, kind: input, shape index: {}]   ;;  %s3783_s11 = inlined_call_operand.hbm [shape: f32[2,8,32], index: 11, kind: output, shape index: {0}]   ;;  %s3784_s12 = inlined_call_operand.hbm [shape: f32[4,2,8,8], index: 12, kind: output, shape index: {1}]  }
   0x1   :  { %19 = vsyncpa [#allocation6], 0 }
   0x2   :  { %20 = vsyncpa [#allocation9], 0 }
   0x3   :  { %21 = vsyncpa [#allocation12], 0 }
   0x4   :  { %22 = vsyncpa [#allocation15], 0 }
   0x5   :  { %23 = vsyncpa [#allocation18], 0 }
   0x6   :  { %24 = vsyncpa [#allocation4], 0 }
   0x7   :  { %25 = vsyncpa [#allocation22], 0  ;;  %s3157_s21 = smov [#allocation5]   ;;  %s3158_s23 = smov [#allocation8]  }
   0x8   :  { %s43_s22 = sshll.u32 %s3157_s21, 4  ;;  %s67_s24 = sshll.u32 %s3158_s23, 4  ;;  %s44_s22 = int_to_ptr.vmem [resolvable:$true] %s43_s22  ;;  %s3249_s24 = int_to_ptr.vmem [resolvable:$true] %s67_s24 }
   0x9   :  { %s2855_s27 = scalar_lea.hbm %s3773_s1, 128 }
   0xa   :  { %p2856_p0 = scmp.ne.s32.totalorder %s3773_s1, %s2855_s27  ;;  %p2859_p1 = scmp.lt.u32.totalorder %s2855_s27, %s3773_s1 }
   0xc   :  { %p2861_p2 = pnand %p2859_p1, %p2856_p0 }
   0xe   :  { %2864 = shalt.err (!%p2861_p2)
}
   0xf   :  { %s2865_s14 = scalar_lea.vmem %s44_s22, 128  ;;  %p2870_p4 = scmp.lt.s32.totalorder %s44_s22, %s44_s22 }
  0x10   :  { %p2866_p3 = scmp.ne.s32.totalorder %s44_s22, %s2865_s14  ;;  %p2871_p5 = scmp.lt.s32.totalorder %s2865_s14, %s2865_s14 }
  0x12   :  { %p2872_p6 = por %p2871_p5, %p2870_p4 }
  0x14   :  { %p2873_p7 = pnand %p2872_p6, %p2866_p3 }
  0x16   :  { %2876 = shalt.err (!%p2873_p7)
}
  0x17   :  { %s3159_s15 = smov 64   ;;  %s3160_s16 = smov 4  }
  0x18   :  { %49 = dma.hbm_to_vmem [thread:$0]  %s3773_s1, 128, %s44_s22, [#allocation6], %s3159_s15, %s3159_s15, %s3160_s16  }
  0x19   :  { %s2877_s21 = scalar_lea.hbm %s3775_s3, 256 }
  0x1a   :  { %p2878_p8 = scmp.ne.s32.totalorder %s3775_s3, %s2877_s21  ;;  %p2881_p9 = scmp.lt.u32.totalorder %s2877_s21, %s3775_s3 }
  0x1c   :  { %p2883_p10 = pnand %p2881_p9, %p2878_p8 }
  0x1e   :  { %2886 = shalt.err (!%p2883_p10)
}
  0x1f   :  { %s2887_s28 = scalar_lea.vmem %s3249_s24, 256  ;;  %p2892_p12 = scmp.lt.s32.totalorder %s3249_s24, %s3249_s24 }
  0x20   :  { %p2888_p11 = scmp.ne.s32.totalorder %s3249_s24, %s2887_s28  ;;  %p2893_p13 = scmp.lt.s32.totalorder %s2887_s28, %s2887_s28 }
  0x22   :  { %p2894_p0 = por %p2893_p13, %p2892_p12 }
  0x24   :  { %p2895_p1 = pnand %p2894_p0, %p2888_p11 }
  0x26   :  { %2898 = shalt.err (!%p2895_p1)
}
  0x27   :  { %73 = dma.hbm_to_vmem [thread:$0]  %s3775_s3, 256, %s3249_s24, [#allocation9], %s3159_s15, %s3159_s15, %s3160_s16  }
  0x28   :  { %s3161_s29 = smov [#allocation11]   ;;  %s3162_s13 = smov [#allocation14]  }
  0x29   :  { %s89_s30 = sshll.u32 %s3161_s29, 4  ;;  %s111_s14 = sshll.u32 %s3162_s13, 4  ;;  %s90_s30 = int_to_ptr.vmem [resolvable:$true] %s89_s30  ;;  %s3286_s14 = int_to_ptr.vmem [resolvable:$true] %s111_s14 }
  0x2a   :  { %s2899_s19 = scalar_lea.hbm %s3777_s5, 256 }
  0x2b   :  { %p2900_p2 = scmp.ne.s32.totalorder %s3777_s5, %s2899_s19  ;;  %p2903_p3 = scmp.lt.u32.totalorder %s2899_s19, %s3777_s5 }
  0x2d   :  { %p2905_p4 = pnand %p2903_p3, %p2900_p2 }
  0x2f   :  { %2908 = shalt.err (!%p2905_p4)
}
  0x30   :  { %s2909_s3 = scalar_lea.vmem %s90_s30, 256  ;;  %p2914_p6 = scmp.lt.s32.totalorder %s90_s30, %s90_s30 }
  0x31   :  { %p2910_p5 = scmp.ne.s32.totalorder %s90_s30, %s2909_s3  ;;  %p2915_p7 = scmp.lt.s32.totalorder %s2909_s3, %s2909_s3 }
  0x33   :  { %p2916_p8 = por %p2915_p7, %p2914_p6 }
  0x35   :  { %p2917_p9 = pnand %p2916_p8, %p2910_p5 }
  0x37   :  { %2920 = shalt.err (!%p2917_p9)
}
  0x38   :  { %95 = dma.hbm_to_vmem [thread:$0]  %s3777_s5, 256, %s90_s30, [#allocation12], %s3159_s15, %s3159_s15, %s3160_s16  }
  0x39   :  { %s2921_s1 = scalar_lea.hbm %s3779_s7, 256 }
  0x3a   :  { %p2922_p10 = scmp.ne.s32.totalorder %s3779_s7, %s2921_s1  ;;  %p2925_p11 = scmp.lt.u32.totalorder %s2921_s1, %s3779_s7 }
  0x3c   :  { %p2927_p12 = pnand %p2925_p11, %p2922_p10 }
  0x3e   :  { %2930 = shalt.err (!%p2927_p12)
}
  0x3f   :  { %s2931_s18 = scalar_lea.vmem %s3286_s14, 256  ;;  %p2936_p0 = scmp.lt.s32.totalorder %s3286_s14, %s3286_s14 }
  0x40   :  { %p2932_p13 = scmp.ne.s32.totalorder %s3286_s14, %s2931_s18  ;;  %p2937_p1 = scmp.lt.s32.totalorder %s2931_s18, %s2931_s18 }
  0x42   :  { %p2938_p2 = por %p2937_p1, %p2936_p0 }
  0x44   :  { %p2939_p3 = pnand %p2938_p2, %p2932_p13 }
  0x46   :  { %2942 = shalt.err (!%p2939_p3)
}
  0x47   :  { %117 = dma.hbm_to_vmem [thread:$0]  %s3779_s7, 256, %s3286_s14, [#allocation15], %s3159_s15, %s3159_s15, %s3160_s16  }
  0x48   :  { %s3163_s19 = smov [#allocation17]   ;;  %s3164_s21 = smov [#allocation2]  }
  0x49   :  { %s133_s20 = sshll.u32 %s3163_s19, 4  ;;  %s31_s23 = sshll.u32 %s3164_s21, 4  ;;  %s134_s20 = int_to_ptr.vmem [resolvable:$true] %s133_s20  ;;  %s3323_s23 = int_to_ptr.vmem [resolvable:$true] %s31_s23 }
  0x4a   :  { %s2943_s24 = scalar_lea.hbm %s3781_s9, 256 }
  0x4b   :  { %p2944_p4 = scmp.ne.s32.totalorder %s3781_s9, %s2943_s24  ;;  %p2947_p5 = scmp.lt.u32.totalorder %s2943_s24, %s3781_s9 }
  0x4d   :  { %p2949_p6 = pnand %p2947_p5, %p2944_p4 }
  0x4f   :  { %2952 = shalt.err (!%p2949_p6)
}
  0x50   :  { %s2953_s7 = scalar_lea.vmem %s134_s20, 256  ;;  %p2958_p8 = scmp.lt.s32.totalorder %s134_s20, %s134_s20 }
  0x51   :  { %p2954_p7 = scmp.ne.s32.totalorder %s134_s20, %s2953_s7  ;;  %p2959_p9 = scmp.lt.s32.totalorder %s2953_s7, %s2953_s7 }
  0x53   :  { %p2960_p10 = por %p2959_p9, %p2958_p8 }
  0x55   :  { %p2961_p11 = pnand %p2960_p10, %p2954_p7 }
  0x57   :  { %2964 = shalt.err (!%p2961_p11)
}
  0x58   :  { %139 = dma.hbm_to_vmem [thread:$0]  %s3781_s9, 256, %s134_s20, [#allocation18], %s3159_s15, %s3159_s15, %s3160_s16  }
  0x59   :  { %s2965_s17 = scalar_lea.hbm %s3772_s0, 128 }
  0x5a   :  { %p2966_p12 = scmp.ne.s32.totalorder %s3772_s0, %s2965_s17  ;;  %p2969_p13 = scmp.lt.u32.totalorder %s2965_s17, %s3772_s0 }
  0x5c   :  { %p2971_p0 = pnand %p2969_p13, %p2966_p12 }
  0x5e   :  { %2974 = shalt.err (!%p2971_p0)
}
  0x5f   :  { %s2975_s21 = scalar_lea.vmem %s3323_s23, 128  ;;  %p2980_p2 = scmp.lt.s32.totalorder %s3323_s23, %s3323_s23 }
  0x60   :  { %p2976_p1 = scmp.ne.s32.totalorder %s3323_s23, %s2975_s21  ;;  %p2981_p3 = scmp.lt.s32.totalorder %s2975_s21, %s2975_s21 }
  0x62   :  { %p2982_p4 = por %p2981_p3, %p2980_p2 }
  0x64   :  { %p2983_p5 = pnand %p2982_p4, %p2976_p1 }
  0x66   :  { %2986 = shalt.err (!%p2983_p5)
}
  0x67   :  { %37 = dma.hbm_to_vmem [thread:$0]  %s3772_s0, 128, %s3323_s23, [#allocation3], %s3159_s15, %s3159_s15, %s3160_s16  }
  0x68   :  { %s3165_s25 = smov [#allocation7]   ;;  %s3166_s24 = smov [#allocation10]  }
  0x69   :  { %s55_s3 = sshll.u32 %s3165_s25, 4  ;;  %s80_s26 = sshll.u32 %s3166_s24, 4  ;;  %s56_s3 = int_to_ptr.vmem [resolvable:$true] %s55_s3  ;;  %s81_s26 = int_to_ptr.vmem [resolvable:$true] %s80_s26 }
  0x6a   :  { %s2987_s1 = scalar_lea.hbm %s3774_s2, 128 }
  0x6b   :  { %p2988_p6 = scmp.ne.s32.totalorder %s3774_s2, %s2987_s1  ;;  %p2991_p7 = scmp.lt.u32.totalorder %s2987_s1, %s3774_s2 }
  0x6d   :  { %p2993_p8 = pnand %p2991_p7, %p2988_p6 }
  0x6f   :  { %2996 = shalt.err (!%p2993_p8)
}
  0x70   :  { %s2997_s0 = scalar_lea.vmem %s56_s3, 128  ;;  %p3002_p10 = scmp.lt.s32.totalorder %s56_s3, %s56_s3 }
  0x71   :  { %p2998_p9 = scmp.ne.s32.totalorder %s56_s3, %s2997_s0  ;;  %p3003_p11 = scmp.lt.s32.totalorder %s2997_s0, %s2997_s0 }
  0x73   :  { %p3004_p12 = por %p3003_p11, %p3002_p10 }
  0x75   :  { %p3005_p13 = pnand %p3004_p12, %p2998_p9 }
  0x77   :  { %3008 = shalt.err (!%p3005_p13)
}
  0x78   :  { %61 = dma.hbm_to_vmem [thread:$0]  %s3774_s2, 128, %s56_s3, [#allocation6], %s3159_s15, %s3159_s15, %s3160_s16  }
  0x79   :  { %s3009_s5 = scalar_lea.hbm %s3776_s4, 16 }
  0x7a   :  { %p3010_p0 = scmp.ne.s32.totalorder %s3776_s4, %s3009_s5  ;;  %p3013_p1 = scmp.lt.u32.totalorder %s3009_s5, %s3776_s4 }
  0x7c   :  { %p3015_p2 = pnand %p3013_p1, %p3010_p0 }
  0x7e   :  { %3018 = shalt.err (!%p3015_p2)
}
  0x7f   :  { %s3019_s20 = scalar_lea.vmem %s81_s26, 16  ;;  %s3023_s25 = scalar_lea.vmem %s81_s26, 32 }
  0x80   :  { %p3020_p3 = scmp.ne.s32.totalorder %s81_s26, %s3019_s20  ;;  %p3024_p4 = scmp.lt.s32.totalorder %s81_s26, %s81_s26 }
  0x81   :  { %p3025_p5 = scmp.lt.s32.totalorder %s3023_s25, %s3019_s20 }
  0x83   :  { %p3026_p6 = por %p3025_p5, %p3024_p4 }
  0x85   :  { %p3027_p7 = pnand %p3026_p6, %p3020_p3 }
  0x87   :  { %3030 = shalt.err (!%p3027_p7)
}
  0x88   :  { %83 = dma.hbm_to_vmem [thread:$0]  %s3776_s4, 16, %s81_s26, [#allocation9]  }
  0x89   :  { %s3167_s16 = smov [#allocation13]   ;;  %s3168_s24 = smov [#allocation16]  }
  0x8a   :  { %s102_s3 = sshll.u32 %s3167_s16, 4  ;;  %s124_s27 = sshll.u32 %s3168_s24, 4  ;;  %s103_s3 = int_to_ptr.vmem [resolvable:$true] %s102_s3  ;;  %s125_s27 = int_to_ptr.vmem [resolvable:$true] %s124_s27 }
  0x8b   :  { %s3031_s7 = scalar_lea.hbm %s3778_s6, 16 }
  0x8c   :  { %p3032_p8 = scmp.ne.s32.totalorder %s3778_s6, %s3031_s7  ;;  %p3035_p9 = scmp.lt.u32.totalorder %s3031_s7, %s3778_s6 }
  0x8e   :  { %p3037_p10 = pnand %p3035_p9, %p3032_p8 }
  0x90   :  { %3040 = shalt.err (!%p3037_p10)
}
  0x91   :  { %s3041_s4 = scalar_lea.vmem %s103_s3, 16  ;;  %s3045_s26 = scalar_lea.vmem %s103_s3, 32 }
  0x92   :  { %p3042_p11 = scmp.ne.s32.totalorder %s103_s3, %s3041_s4  ;;  %p3046_p12 = scmp.lt.s32.totalorder %s103_s3, %s103_s3 }
  0x93   :  { %p3047_p13 = scmp.lt.s32.totalorder %s3045_s26, %s3041_s4 }
  0x95   :  { %p3048_p0 = por %p3047_p13, %p3046_p12 }
  0x97   :  { %p3049_p1 = pnand %p3048_p0, %p3042_p11 }
  0x99   :  { %3052 = shalt.err (!%p3049_p1)
}
  0x9a   :  { %105 = dma.hbm_to_vmem [thread:$0]  %s3778_s6, 16, %s103_s3, [#allocation12]  }
  0x9b   :  { %s3053_s5 = scalar_lea.hbm %s3780_s8, 16 }
  0x9c   :  { %p3054_p2 = scmp.ne.s32.totalorder %s3780_s8, %s3053_s5  ;;  %p3057_p3 = scmp.lt.u32.totalorder %s3053_s5, %s3780_s8 }
  0x9e   :  { %p3059_p4 = pnand %p3057_p3, %p3054_p2 }
  0xa0   :  { %3062 = shalt.err (!%p3059_p4)
}
  0xa1   :  { %s3063_s20 = scalar_lea.vmem %s125_s27, 16  ;;  %s3067_s25 = scalar_lea.vmem %s125_s27, 32 }
  0xa2   :  { %p3064_p5 = scmp.ne.s32.totalorder %s125_s27, %s3063_s20  ;;  %p3068_p6 = scmp.lt.s32.totalorder %s125_s27, %s125_s27 }
  0xa3   :  { %p3069_p7 = scmp.lt.s32.totalorder %s3067_s25, %s3063_s20 }
  0xa5   :  { %p3070_p8 = por %p3069_p7, %p3068_p6 }
  0xa7   :  { %p3071_p9 = pnand %p3070_p8, %p3064_p5 }
  0xa9   :  { %3074 = shalt.err (!%p3071_p9)
}
  0xaa   :  { %127 = dma.hbm_to_vmem [thread:$0]  %s3780_s8, 16, %s125_s27, [#allocation15]  }
  0xab   :  { %s3169_s15 = smov [#allocation19]   ;;  %s3075_s28 = scalar_lea.hbm %s3782_s10, 16 }
  0xac   :  { %s146_s16 = sshll.u32 %s3169_s15, 4  ;;  %p3076_p10 = scmp.ne.s32.totalorder %s3782_s10, %s3075_s28  ;;  %s147_s16 = int_to_ptr.vmem [resolvable:$true] %s146_s16 }
  0xad   :  { %p3079_p11 = scmp.lt.u32.totalorder %s3075_s28, %s3782_s10 }
  0xaf   :  { %p3081_p12 = pnand %p3079_p11, %p3076_p10 }
  0xb1   :  { %3084 = shalt.err (!%p3081_p12)
}
  0xb2   :  { %s3085_s29 = scalar_lea.vmem %s147_s16, 16  ;;  %s3089_s8 = scalar_lea.vmem %s147_s16, 32 }
  0xb3   :  { %p3086_p13 = scmp.ne.s32.totalorder %s147_s16, %s3085_s29  ;;  %p3090_p0 = scmp.lt.s32.totalorder %s147_s16, %s147_s16 }
  0xb4   :  { %p3091_p1 = scmp.lt.s32.totalorder %s3089_s8, %s3085_s29 }
  0xb6   :  { %p3092_p2 = por %p3091_p1, %p3090_p0 }
  0xb8   :  { %p3093_p3 = pnand %p3092_p2, %p3086_p13 }
  0xba   :  { %3096 = shalt.err (!%p3093_p3)
}
  0xbb   :  { %149 = dma.hbm_to_vmem [thread:$0]  %s3782_s10, 16, %s147_s16, [#allocation18]  }
  0xbc   :  { %3141 = dma.done.wait [#allocation3], 128  }
  0xbd   :  { %3142 = vsyncadd [#allocation3], 4294967168 }
  0xbe   :  { %3143 = dma.done.wait [#allocation6], 256  }
  0xbf   :  { %3144 = vsyncadd [#allocation6], 4294967040 }
  0xc0   :  { %3145 = dma.done.wait [#allocation9], 272  }
  0xc1   :  { %3146 = vsyncadd [#allocation9], 4294967024 }
  0xc2   :  { %3147 = dma.done.wait [#allocation12], 272  }
  0xc3   :  { %3148 = vsyncadd [#allocation12], 4294967024 }
  0xc4   :  { %3149 = dma.done.wait [#allocation15], 272  }
  0xc5   :  { %3150 = vsyncadd [#allocation15], 4294967024 }
  0xc6   :  { %3151 = dma.done.wait [#allocation18], 272  }
  0xc7   :  { %3152 = vsyncadd [#allocation18], 4294967024  ;;  %v3170_v0 = vmov 0.0   ;;  %vm3171_vm0 = vmmov 0   ;;  %v2812_v1 = vld [vmem:[#allocation11] sm:$0xff]   ;;  %v2813_v2 = vld [vmem:[#allocation8] sm:$0xff]   ;;  %v295_v30 = vlaneseq }
  0xc8   :  { %2665 = vmatprep.subr.bf16.mxu1 %v3170_v0  ;;  %2657 = vmatprep.subr.bf16.mxu0 %v3170_v0  ;;  %v2814_v3 = vld [vmem:[#allocation11 + $0x8] sm:$0xff]   ;;  %v2815_v4 = vld [vmem:[#allocation8 + $0x8] sm:$0xff]   ;;  %v2816_v5 = vld [vmem:[#allocation5] sm:$0xff]   ;;  %vm214_vm1 = vcmask 261120   ;;  %s3172_s10 = smov 104   ;;  %s3173_s4 = smov 120  }
  0xc9   :  { %2669 = vmatprep.mubr.msk.bf16.mxu1 %vm3171_vm0, %v3170_v0  ;;  %2661 = vmatprep.mubr.msk.bf16.mxu0 %vm3171_vm0, %v3170_v0  ;;  %v2817_v6 = vld [vmem:[#allocation2] sm:$0xff]   ;;  %v2534_v7 = vld [vmem:[#allocation10] ss:$0 sm:$0xff]  ;;  %v2551_v8 = vld [vmem:[#allocation13] ss:$0 sm:$0xff]  ;;  %s3174_s26 = smov 112  }
  0xca   :  { %2666 = vmatpush3.bf16.msra.mxu1 %v2812_v1  ;;  %2658 = vmatpush3.bf16.msra.mxu0 %v2813_v2  ;;  %v2818_v25 = vld [vmem:[#allocation14] sm:$0xff]   ;;  %v2819_v26 = vld [vmem:[#allocation14 + $0x8] sm:$0xff]   ;;  %v2820_v27 = vld [vmem:[#allocation7] sm:$0xff]   ;;  %v3175_v28 = vmov 1983009808   ;;  %v296_v34 = vshrl.u32 %v295_v30, 7 }
  0xcb   :  { %2667 = vmatprep.subr.bf16.mxu1 %v3170_v0  ;;  %2659 = vmatprep.subr.bf16.mxu0 %v3170_v0  ;;  %v293_v29 = vunpack.c.l.s4 %v3175_v28  ;;  %v3176_v31 = vmov 1934713408   ;;  %v3177_v35 = vmov 0   ;;  %vm1267_vm2 = vcmask 64512   ;;  %s3178_s23 = smov 8   ;;  %s3179_s13 = smov 16  }
  0xcc   :  { %v324_v32 = vunpack.c.l.s4 %v3176_v31  ;;  %v3452_v36 = vpack.i.b16 %v3177_v35, %v3177_v35  ;;  %vm1743_vm3 = vcmask 1043456   ;;  %s3180_s17 = smov 24   ;;  %vm2422_vm4 = vcmask 130048   ;;  %s3181_s18 = smov [#allocation21]  }
  0xcd   :  { %v294_v33 = vunpack.c.0.s8 %v293_v29  ;;  %vm2425_vm5 = vcmask 195584   ;;  %s2513_s5 = sshll.u32 %s3181_s18, 4  ;;  %s2514_s5 = int_to_ptr.vmem [resolvable:$true] %s2513_s5 }
  0xce   :  { %2668 = vmatpush3.bf16.msra.mxu1 %v2814_v3  ;;  %2660 = vmatpush3.bf16.msra.mxu0 %v2815_v4  ;;  %v325_v39 = vunpack.c.0.s8 %v324_v32  ;;  %s3097_s30 = scalar_lea.vmem %s2514_s5, 1024  ;;  %p3102_p5 = scmp.lt.s32.totalorder %s2514_s5, %s2514_s5 }
  0xcf   :  { %2681 = vmatprep.subr.bf16.mxu1 %v3170_v0  ;;  %2673 = vmatprep.subr.bf16.mxu0 %v3170_v0  ;;  %v3454_v43 = vsub.s32 %v294_v33, %v296_v34  ;;  %p3098_p4 = scmp.ne.s32.totalorder %s2514_s5, %s3097_s30  ;;  %p3103_p6 = scmp.lt.s32.totalorder %s3097_s30, %s3097_s30 }
  0xd0   :  { %v3457_v46 = vsub.s32 %v325_v39, %v296_v34 }
  0xd1   :  { %2670 = vmatmul.mubr.msk.bf16.vlgmr.msra.gmra.mrb[0].mxu1 %vm214_vm1, %v2816_v5  ;;  %2662 = vmatmul.mubr.msk.bf16.vlgmr.msra.gmra.mrb[0].mxu0 %vm214_vm1, %v2817_v6  ;;  %p3104_p7 = por %p3103_p6, %p3102_p5 }
  0xd2   :  { %2683 = vmatprep.mubr.msk.bf16.mxu1 %vm3171_vm0, %v3170_v0  ;;  %2677 = vmatprep.mubr.msk.bf16.mxu0 %vm3171_vm0, %v3170_v0 }
  0xd3   :  { %2674 = vmatpush3.bf16.msra.mxu0 %v2818_v25  ;;  %p3105_p8 = pnand %p3104_p7, %p3098_p4 }
  0xd4   :  { %2675 = vmatprep.subr.bf16.mxu0 %v3170_v0 }
  0xd7   :  { %2676 = vmatpush3.bf16.msra.mxu0 %v2819_v26 }
  0xd8   :  { %2687 = vmatprep.subr.bf16.mxu0 %v3170_v0 }
  0xda   :  { %2678 = vmatmul.mubr.msk.bf16.vlgmr.msra.gmra.mrb[4].mxu0 %vm214_vm1, %v2820_v27 }
  0xdb   :  { %2689 = vmatprep.mubr.msk.bf16.mxu0 %vm3171_vm0, %v3170_v0 }
 0x1a4   :  { %v618_v9 = vpop.f32.mrb[0].mxu1  ;;  %v252_v11 = vpop.f32.mrb[0].mxu0 }
 0x1a5   :  { %v2671_v10 = vpop.f32.mrb[1].mxu1  ;;  %v253_v12 = vadd.f32 %v2534_v7, %v252_v11  ;;  %v2663_v14 = vpop.f32.mrb[1].mxu0  ;;  %v619_v15 = vadd.f32 %v2551_v8, %v618_v9 }
 0x1a6   :  { %v621_v13 = vpop.f32.mrb[2].mxu1  ;;  %v255_v18 = vpop.f32.mrb[2].mxu0 }
 0x1a7   :  { %v622_v16 = vadd.f32 %v2551_v8, %v621_v13  ;;  %v2672_v17 = vpop.f32.mrb[3].mxu1  ;;  %v259_v19 = vmul.f32 0.35355338, %v253_v12  ;;  %v256_v20 = vadd.f32 %v2534_v7, %v255_v18  ;;  %v2664_v21 = vpop.f32.mrb[3].mxu0 }
 0x1a9   :  { %v625_v22 = vpack.c.bf16 %v622_v16, %v619_v15  ;;  %v260_v23 = vmul.f32 0.35355338, %v256_v20 }
 0x1ab   :  { %631 = vrot.lane.b32.xlu1 %v625_v22, %s3172_s10  ;;  %627 = vrot.lane.b32.xlu0 %v625_v22, %s3173_s4  ;;  %v261_v24 = vpack.c.bf16 %v260_v23, %v259_v19  ;;  %v637_v41 = vshrl.u32 %v625_v22, 16 }
 0x1ad   :  { %v273_v52 = vshrl.u32 %v261_v24, 16 }
 0x1af   :  { %629 = vrot.lane.b32.xlu0 %v625_v22, %s3174_s26  ;;  %263 = vrot.lane.b32.xlu1 %v261_v24, %s3173_s4 }
 0x1b3   :  { %265 = vrot.lane.b32.xlu0 %v261_v24, %s3174_s26  ;;  %267 = vrot.lane.b32.xlu1 %v261_v24, %s3172_s10 }
 0x21d   :  { %v632_v37 = vpop.permute.xlu1 %631  ;;  %v628_v38 = vpop.permute.xlu0 %627 }
 0x21e   :  { %v635_v40 = vpack.i.b16 %v628_v38, %v625_v22  ;;  %v638_v42 = vshrl.u32 %v628_v38, 16  ;;  %v646_v49 = vshrl.u32 %v632_v37, 16 }
 0x220   :  { %v639_v44 = vpack.i.b16 %v638_v42, %v637_v41  ;;  %v649_v45 = vcombine.high %v635_v40, %v3452_v36  ;;  %v656_v53 = vrot.slane %v635_v40, %v3454_v43 }
 0x221   :  { %v630_v47 = vpop.permute.xlu0 %629  ;;  %v264_v48 = vpop.permute.xlu1 %263 }
 0x222   :  { %v715_v50 = vcombine.high %v639_v44, %v3452_v36  ;;  %v643_v51 = vpack.i.b16 %v632_v37, %v630_v47  ;;  %v645_v54 = vshrl.u32 %v630_v47, 16  ;;  %v271_v55 = vpack.i.b16 %v264_v48, %v261_v24 }
 0x223   :  { %v274_v56 = vshrl.u32 %v264_v48, 16  ;;  %v663_v57 = vrot.slane %v649_v45, %v3454_v43  ;;  %v722_v58 = vrot.slane %v639_v44, %v3454_v43 }
 0x224   :  { %v664_v59 = vcombine.high %v643_v51, %v3452_v36  ;;  %v671_v60 = vrot.slane %v643_v51, %v3454_v43  ;;  %v729_v61 = vrot.slane %v715_v50, %v3454_v43  ;;  %v647_v62 = vpack.i.b16 %v646_v49, %v645_v54 }
 0x225   :  { %v275_v63 = vpack.i.b16 %v274_v56, %v273_v52  ;;  %v291_v1 = vcombine.high %v271_v55, %v3452_v36  ;;  %v266_v2 = vpop.permute.xlu0 %265  ;;  %v298_v6 = vrot.slane %v271_v55, %v3454_v43  ;;  %v268_v27 = vpop.permute.xlu1 %267 }
 0x226   :  { %v678_v3 = vrot.slane %v664_v59, %v3454_v43  ;;  %v679_v4 = vcombine.low %v656_v53, %v671_v60  ;;  %v680_v5 = vcombine.high %v656_v53, %v671_v60  ;;  %v730_v7 = vcombine.high %v647_v62, %v3452_v36 }
 0x227   :  { %v737_v8 = vrot.slane %v647_v62, %v3454_v43  ;;  %v305_v9 = vrot.slane %v291_v1, %v3454_v43  ;;  %v281_v10 = vshrl.u32 %v266_v2, 16  ;;  %v357_v18 = vcombine.high %v275_v63, %v3452_v36 }
 0x228   :  { %v687_v11 = vrot.slane %v679_v4, %v3457_v46  ;;  %v694_v12 = vrot.slane %v680_v5, %v3457_v46  ;;  %v695_v13 = vcombine.low %v663_v57, %v678_v3  ;;  %v696_v14 = vcombine.high %v663_v57, %v678_v3 }
 0x229   :  { %v744_v15 = vrot.slane %v730_v7, %v3454_v43  ;;  %v745_v16 = vcombine.low %v722_v58, %v737_v8  ;;  %v746_v17 = vcombine.high %v722_v58, %v737_v8  ;;  %v364_v40 = vrot.slane %v275_v63, %v3454_v43 }
 0x22a   :  { %v703_v19 = vrot.slane %v695_v13, %v3457_v46  ;;  %v710_v20 = vrot.slane %v696_v14, %v3457_v46  ;;  %v781_v21 = vcombine.low %v687_v11, %v694_v12  ;;  %v2556_v22 = vcombine.high %v687_v11, %v694_v12 }
 0x22b   :  { %v753_v23 = vrot.slane %v745_v16, %v3457_v46  ;;  %v760_v24 = vrot.slane %v746_v17, %v3457_v46  ;;  %v761_v25 = vcombine.low %v729_v61, %v744_v15  ;;  %v762_v26 = vcombine.high %v729_v61, %v744_v15 }
 0x22c   :  { %v788_v28 = vrot.slane %v781_v21, %v3454_v43  ;;  %v796_v29 = vrot.slane %v2556_v22, %v3454_v43  ;;  %v797_v30 = vcombine.low %v703_v19, %v710_v20  ;;  %v2557_v31 = vcombine.high %v703_v19, %v710_v20 }
 0x22d   :  { %v769_v32 = vrot.slane %v761_v25, %v3457_v46  ;;  %v776_v33 = vrot.slane %v762_v26, %v3457_v46  ;;  %v831_v34 = vcombine.low %v753_v23, %v760_v24  ;;  %v2558_v37 = vcombine.high %v753_v23, %v760_v24 }
 0x22e   :  { %v804_v38 = vrot.slane %v797_v30, %v3454_v43  ;;  %v812_v39 = vrot.slane %v2557_v31, %v3454_v43  ;;  %v279_v41 = vpack.i.b16 %v268_v27, %v266_v2  ;;  %v282_v48 = vshrl.u32 %v268_v27, 16 }
 0x22f   :  { %v838_v42 = vrot.slane %v831_v34, %v3454_v43  ;;  %v846_v44 = vrot.slane %v2558_v37, %v3454_v43  ;;  %v847_v45 = vcombine.low %v769_v32, %v776_v33  ;;  %v2559_v47 = vcombine.high %v769_v32, %v776_v33 }
 0x230   :  { %v306_v49 = vcombine.high %v279_v41, %v3452_v36  ;;  %v313_v50 = vrot.slane %v279_v41, %v3454_v43  ;;  %v813_v51 = vcombine.low %v788_v28, %v796_v29  ;;  %v821_v52 = vcombine.low %v804_v38, %v812_v39 }
 0x231   :  { %v854_v53 = vrot.slane %v847_v45, %v3454_v43  ;;  %v862_v54 = vrot.slane %v2559_v47, %v3454_v43  ;;  %v863_v55 = vcombine.low %v838_v42, %v846_v44  ;;  %v283_v56 = vpack.i.b16 %v282_v48, %v281_v10 }
 0x232   :  { %v320_v57 = vrot.slane %v306_v49, %v3454_v43  ;;  %v321_v58 = vcombine.low %v298_v6, %v313_v50  ;;  %v322_v59 = vcombine.high %v298_v6, %v313_v50  ;;  %v371_v60 = vrot.slane %v357_v18, %v3454_v43 }
 0x233   :  { %v3496_v61 = vrot.slane %v813_v51, %v3457_v46  ;;  %v3499_v62 = vrot.slane %v821_v52, %v3457_v46  ;;  %v871_v63 = vcombine.low %v854_v53, %v862_v54  ;;  %v372_v5 = vcombine.high %v283_v56, %v3452_v36 }
 0x234   :  { %v329_v1 = vrot.slane %v321_v58, %v3457_v46  ;;  %v336_v2 = vrot.slane %v322_v59, %v3457_v46  ;;  %v337_v3 = vcombine.low %v305_v9, %v320_v57  ;;  %v338_v4 = vcombine.high %v305_v9, %v320_v57 }
 0x235   :  { %v379_v6 = vrot.slane %v283_v56, %v3454_v43  ;;  %v870_v7 = vrot.slane %v863_v55, %v3457_v46  ;;  %v878_v8 = vrot.slane %v871_v63, %v3457_v46  ;;  %v386_v14 = vrot.slane %v372_v5, %v3454_v43 }
 0x236   :  { %v345_v10 = vrot.slane %v337_v3, %v3457_v46  ;;  %v352_v11 = vrot.slane %v338_v4, %v3457_v46  ;;  %v423_v12 = vcombine.low %v329_v1, %v336_v2  ;;  %v2539_v13 = vcombine.high %v329_v1, %v336_v2 }
 0x237   :  { %v387_v15 = vcombine.low %v364_v40, %v379_v6  ;;  %v388_v16 = vcombine.high %v364_v40, %v379_v6  ;;  %v879_v17 = vcombine.low %v870_v7, %v878_v8  ;;  %v829_v20 = vcombine.low %v3496_v61, %v3499_v62 }
 0x238   :  { %v430_v9 = vrot.slane %v423_v12, %v3454_v43  ;;  %v439_v18 = vcombine.low %v345_v10, %v352_v11  ;;  %v2540_v19 = vcombine.high %v345_v10, %v352_v11  ;;  %v403_v23 = vcombine.low %v371_v60, %v386_v14 }
 0x239   :  { %v395_v21 = vrot.slane %v387_v15, %v3457_v46  ;;  %v402_v22 = vrot.slane %v388_v16, %v3457_v46  ;;  %v404_v24 = vcombine.high %v371_v60, %v386_v14  ;;  %v438_v25 = vrot.slane %v2539_v13, %v3454_v43 }
 0x23a   :  { %v446_v26 = vrot.slane %v439_v18, %v3454_v43  ;;  %v454_v27 = vrot.slane %v2540_v19, %v3454_v43  ;;  %v883_v28 = vpack.i.b16 %v879_v17, %v829_v20  ;;  %v411_v29 = vrot.slane %v403_v23, %v3457_v46 }
 0x23b   :  { %v418_v30 = vrot.slane %v404_v24, %v3457_v46  ;;  %v473_v31 = vcombine.low %v395_v21, %v402_v22  ;;  %v2541_v32 = vcombine.high %v395_v21, %v402_v22  ;;  %v455_v42 = vcombine.low %v430_v9, %v438_v25 }
 0x23c   :  { %v463_v33 = vcombine.low %v446_v26, %v454_v27  ;;  %v2560_v34 = vcombine.low %v883_v28, %v883_v28  ;;  %v2561_v37 = vcombine.high %v883_v28, %v883_v28  ;;  %v885_v50 = vshrl.u32 %v879_v17, 16 }
 0x23d   :  { %v480_v38 = vrot.slane %v473_v31, %v3454_v43  ;;  %v488_v39 = vrot.slane %v2541_v32, %v3454_v43  ;;  %v489_v40 = vcombine.low %v411_v29, %v418_v30  ;;  %v2542_v41 = vcombine.high %v411_v29, %v418_v30 }
 0x23e   :  { %v1272_v44 = vsel %vm1267_vm2, %v2560_v34, 0  ;;  %v1318_v45 = vsel %vm1267_vm2, %v2561_v37, 0  ;;  %v470_v51 = vrot.slane %v463_v33, %v3457_v46  ;;  %v884_v53 = vshrl.u32 %v829_v20, 16  ;;  %v2568_v33 = vld [vmem:[#allocation16] ss:$0 sm:$0xff]  ;;  %v976_v34 = vpop.f32.mrb[4].mxu0 }
 0x23f   :  { %v496_v47 = vrot.slane %v489_v40, %v3454_v43  ;;  %v504_v48 = vrot.slane %v2542_v41, %v3454_v43  ;;  %v505_v49 = vcombine.low %v480_v38, %v488_v39  ;;  %2682 = vmatpush3.bf16.xpose.msra.mxu1 %v1272_v44  ;;  %2688 = vmatpush3.bf16.xpose.msra.mxu0 %v1318_v45  ;;  %v2679_v38 = vpop.f32.mrb[5].mxu0 }
 0x240   :  { %2693 = vmatprep.subr.bf16.mxu1 %v3170_v0  ;;  %2699 = vmatprep.subr.bf16.mxu0 %v3170_v0  ;;  %v462_v54 = vrot.slane %v455_v42, %v3457_v46  ;;  %v886_v57 = vpack.i.b16 %v885_v50, %v884_v53  ;;  %v880_v2 = vcombine.high %v870_v7, %v878_v8  ;;  %v979_v39 = vpop.f32.mrb[6].mxu0 }
 0x241   :  { %v513_v52 = vcombine.low %v496_v47, %v504_v48  ;;  %v512_v55 = vrot.slane %v505_v49, %v3457_v46  ;;  %v830_v6 = vcombine.high %v3496_v61, %v3499_v62  ;;  %v977_v37 = vadd.f32 %v2568_v33, %v976_v34  ;;  %v2680_v41 = vpop.f32.mrb[7].mxu0 }
 0x242   :  { %v471_v58 = vcombine.low %v462_v54, %v470_v51  ;;  %v2562_v63 = vcombine.low %v886_v57, %v886_v57  ;;  %v2563_v1 = vcombine.high %v886_v57, %v886_v57  ;;  %v891_v8 = vshrl.u32 %v880_v2, 16 }
 0x243   :  { %v520_v56 = vrot.slane %v513_v52, %v3457_v46  ;;  %v889_v13 = vpack.i.b16 %v880_v2, %v830_v6  ;;  %v890_v17 = vshrl.u32 %v830_v6, 16  ;;  %v472_v19 = vcombine.high %v462_v54, %v470_v51 }
 0x244   :  { %v1364_v10 = vsel %vm1267_vm2, %v2562_v63, 0  ;;  %v1410_v11 = vsel %vm1267_vm2, %v2563_v1, 0  ;;  %v526_v12 = vshrl.u32 %v471_v58, 16  ;;  %v980_v40 = vadd.f32 %v2568_v33, %v979_v39 }
 0x245   :  { %v521_v59 = vcombine.low %v512_v55, %v520_v56  ;;  %v2564_v61 = vcombine.low %v889_v13, %v889_v13  ;;  %v2565_v62 = vcombine.high %v889_v13, %v889_v13  ;;  %v522_v16 = vcombine.high %v512_v55, %v520_v56 }
 0x246   :  { %v892_v20 = vpack.i.b16 %v891_v8, %v890_v17  ;;  %v532_v29 = vshrl.u32 %v472_v19, 16  ;;  %v3570_v42 = vpack.c.bf16 %v980_v40, %v977_v37 }
 0x247   :  { %v525_v60 = vpack.i.b16 %v521_v59, %v471_v58  ;;  %v527_v5 = vshrl.u32 %v521_v59, 16  ;;  %v1456_v9 = vsel %vm1267_vm2, %v2564_v61, 0  ;;  %v1502_v18 = vsel %vm1267_vm2, %v2565_v62, 0 }
 0x248   :  { %v531_v21 = vpack.i.b16 %v522_v16, %v472_v19  ;;  %v2566_v22 = vcombine.low %v892_v20, %v892_v20  ;;  %v2567_v23 = vcombine.high %v892_v20, %v892_v20  ;;  %v533_v26 = vshrl.u32 %v522_v16, 16 }
 0x249   :  { %v2543_v3 = vcombine.low %v525_v60, %v525_v60  ;;  %v2544_v4 = vcombine.high %v525_v60, %v525_v60  ;;  %v528_v7 = vpack.i.b16 %v527_v5, %v526_v12 }
 0x24a   :  { %v2547_v24 = vcombine.low %v531_v21, %v531_v21  ;;  %v2548_v25 = vcombine.high %v531_v21, %v531_v21  ;;  %v1548_v27 = vsel %vm1267_vm2, %v2566_v22, 0  ;;  %v1594_v28 = vsel %vm1267_vm2, %v2567_v23, 0 }
 0x24b   :  { %2684 = vmatmul.mubr.msk.bf16.vlgmr.msra.gmra.mrb[4].mxu1 %vm1267_vm2, %v2543_v3  ;;  %2690 = vmatmul.mubr.msk.bf16.vlgmr.msra.gmra.mrb[8].mxu0 %vm1267_vm2, %v2544_v4  ;;  %v2545_v14 = vcombine.low %v528_v7, %v528_v7  ;;  %v2546_v15 = vcombine.high %v528_v7, %v528_v7  ;;  %v534_v30 = vpack.i.b16 %v533_v26, %v532_v29 }
 0x24c   :  { %2694 = vmatpush3.bf16.xpose.msra.mxu1 %v1364_v10  ;;  %2700 = vmatpush3.bf16.xpose.msra.mxu0 %v1410_v11 }
 0x24d   :  { %2695 = vmatprep.mubr.msk.bf16.mxu1 %vm3171_vm0, %v3170_v0  ;;  %2701 = vmatprep.mubr.msk.bf16.mxu0 %vm3171_vm0, %v3170_v0  ;;  %v2549_v31 = vcombine.low %v534_v30, %v534_v30  ;;  %v2550_v32 = vcombine.high %v534_v30, %v534_v30 }
 0x24e   :  { %2705 = vmatprep.subr.bf16.mxu1 %v3170_v0  ;;  %2711 = vmatprep.subr.bf16.mxu0 %v3170_v0 }
 0x253   :  { %2696 = vmatmul.mubr.msk.bf16.vlgmr.msra.gmra.mrb[8].mxu1 %vm1267_vm2, %v2545_v14  ;;  %2702 = vmatmul.mubr.msk.bf16.vlgmr.msra.gmra.mrb[12].mxu0 %vm1267_vm2, %v2546_v15 }
 0x254   :  { %2706 = vmatpush3.bf16.xpose.msra.mxu1 %v1456_v9  ;;  %2712 = vmatpush3.bf16.xpose.msra.mxu0 %v1502_v18 }
 0x255   :  { %2707 = vmatprep.mubr.msk.bf16.mxu1 %vm3171_vm0, %v3170_v0  ;;  %2713 = vmatprep.mubr.msk.bf16.mxu0 %vm3171_vm0, %v3170_v0 }
 0x256   :  { %2717 = vmatprep.subr.bf16.mxu1 %v3170_v0  ;;  %2723 = vmatprep.subr.bf16.mxu0 %v3170_v0 }
 0x25b   :  { %2708 = vmatmul.mubr.msk.bf16.vlgmr.msra.gmra.mrb[12].mxu1 %vm1267_vm2, %v2547_v24  ;;  %2714 = vmatmul.mubr.msk.bf16.vlgmr.msra.gmra.mrb[16].mxu0 %vm1267_vm2, %v2548_v25 }
 0x25c   :  { %2718 = vmatpush3.bf16.xpose.msra.mxu1 %v1548_v27  ;;  %2724 = vmatpush3.bf16.xpose.msra.mxu0 %v1594_v28 }
 0x25d   :  { %2719 = vmatprep.mubr.msk.bf16.mxu1 %vm3171_vm0, %v3170_v0  ;;  %2725 = vmatprep.mubr.msk.bf16.mxu0 %vm3171_vm0, %v3170_v0 }
 0x25e   :  { %2729 = vmatprep.subr.bf16.mxu1 %v3170_v0  ;;  %2735 = vmatprep.subr.bf16.mxu0 %v3170_v0 }
 0x263   :  { %2720 = vmatmul.mubr.msk.bf16.vlgmr.msra.gmra.mrb[16].mxu1 %vm1267_vm2, %v2549_v31  ;;  %2726 = vmatmul.mubr.msk.bf16.vlgmr.msra.gmra.mrb[20].mxu0 %vm1267_vm2, %v2550_v32 }
 0x264   :  { %2731 = vmatprep.mubr.msk.bf16.mxu1 %vm3171_vm0, %v3170_v0  ;;  %2737 = vmatprep.mubr.msk.bf16.mxu0 %vm3171_vm0, %v3170_v0 }
 0x31e   :  { %v1308_v44 = vpop.f32.mrb[4].mxu1  ;;  %v1354_v45 = vpop.f32.mrb[8].mxu0 }
 0x31f   :  { %v2685_v47 = vpop.f32.mrb[5].mxu1  ;;  %v2691_v48 = vpop.f32.mrb[9].mxu0  ;;  %v1636_v49 = vsel %vm1267_vm2, %v1308_v44, -inf  ;;  %v1639_v50 = vsel %vm1267_vm2, %v1354_v45, -inf }
 0x320   :  { %1637 = vmax.xlane.f32.xlu0 %v1636_v49  ;;  %v1311_v51 = vpop.f32.mrb[6].mxu1  ;;  %1640 = vmax.xlane.f32.xlu1 %v1639_v50  ;;  %v1357_v52 = vpop.f32.mrb[10].mxu0 }
 0x321   :  { %v2686_v53 = vpop.f32.mrb[7].mxu1  ;;  %v2692_v54 = vpop.f32.mrb[11].mxu0 }
 0x326   :  { %v1400_v55 = vpop.f32.mrb[8].mxu1  ;;  %v1446_v56 = vpop.f32.mrb[12].mxu0 }
 0x327   :  { %v2697_v57 = vpop.f32.mrb[9].mxu1  ;;  %v2703_v58 = vpop.f32.mrb[13].mxu0  ;;  %v1642_v59 = vsel %vm1267_vm2, %v1400_v55, -inf  ;;  %v1645_v3 = vsel %vm1267_vm2, %v1446_v56, -inf }
 0x328   :  { %1643 = vmax.xlane.f32.xlu0 %v1642_v59  ;;  %v1403_v60 = vpop.f32.mrb[10].mxu1  ;;  %v1449_v63 = vpop.f32.mrb[14].mxu0 }
 0x329   :  { %v2698_v1 = vpop.f32.mrb[11].mxu1  ;;  %v2704_v2 = vpop.f32.mrb[15].mxu0  ;;  %v995_v60 = vshrl.u32 %v3570_v42, 16 }
 0x32c   :  { %1646 = vmax.xlane.f32.xlu0 %v1645_v3 }
 0x32e   :  { %v1492_v4 = vpop.f32.mrb[12].mxu1  ;;  %v1538_v5 = vpop.f32.mrb[16].mxu0 }
 0x32f   :  { %v2709_v6 = vpop.f32.mrb[13].mxu1  ;;  %v2715_v10 = vpop.f32.mrb[17].mxu0  ;;  %v1648_v11 = vsel %vm1267_vm2, %v1492_v4, -inf  ;;  %v1651_v12 = vsel %vm1267_vm2, %v1538_v5, -inf }
 0x330   :  { %v1495_v13 = vpop.f32.mrb[14].mxu1  ;;  %1649 = vmax.xlane.f32.xlu1 %v1648_v11  ;;  %1652 = vmax.xlane.f32.xlu0 %v1651_v12  ;;  %v1541_v7 = vpop.f32.mrb[18].mxu0 }
 0x331   :  { %v2710_v61 = vpop.f32.mrb[15].mxu1  ;;  %v2716_v62 = vpop.f32.mrb[19].mxu0 }
 0x336   :  { %v1584_v8 = vpop.f32.mrb[16].mxu1  ;;  %v1630_v14 = vpop.f32.mrb[20].mxu0 }
 0x337   :  { %v2721_v15 = vpop.f32.mrb[17].mxu1  ;;  %v2727_v16 = vpop.f32.mrb[21].mxu0  ;;  %v1654_v17 = vsel %vm1267_vm2, %v1584_v8, -inf  ;;  %v1657_v9 = vsel %vm1267_vm2, %v1630_v14, -inf }
 0x338   :  { %v1587_v18 = vpop.f32.mrb[18].mxu1  ;;  %1655 = vmax.xlane.f32.xlu1 %v1654_v17  ;;  %1658 = vmax.xlane.f32.xlu0 %v1657_v9  ;;  %v1633_v19 = vpop.f32.mrb[22].mxu0 }
 0x339   :  { %v2722_v20 = vpop.f32.mrb[19].mxu1  ;;  %v2728_v21 = vpop.f32.mrb[23].mxu0 }
 0x349   :  { %985 = vrot.lane.b32.xlu1 %v3570_v42, %s3173_s4 }
 0x34d   :  { %989 = vrot.lane.b32.xlu1 %v3570_v42, %s3172_s10 }
 0x34e   :  { %987 = vrot.lane.b32.xlu0 %v3570_v42, %s3174_s26 }
 0x3ad   :  { %v1638_v22 = vpop.xlane.xlu0 %1637  ;;  %v1641_v23 = vpop.xlane.xlu1 %1640 }
 0x3ae   :  { %v1660_v24 = vsub.f32 %v1308_v44, %v1638_v22  ;;  %v1661_v25 = vsub.f32 %v1354_v45, %v1641_v23 }
 0x3b0   :  { %v1668_v26 = vmul.f32 1.442695, %v1660_v24  ;;  %v1670_v27 = vmul.f32 1.442695, %v1661_v25 }
 0x3b2   :  { %2823 = vpow2.f32 %v1668_v26 }
 0x3b3   :  { %2825 = vpow2.f32 %v1670_v27 }
 0x3b5   :  { %v1644_v28 = vpop.xlane.xlu0 %1643 }
 0x3b6   :  { %v1662_v29 = vsub.f32 %v1400_v55, %v1644_v28 }
 0x3b8   :  { %v1672_v30 = vmul.f32 1.442695, %v1662_v29 }
 0x3b9   :  { %v1647_v31 = vpop.xlane.xlu0 %1646 }
 0x3ba   :  { %2827 = vpow2.f32 %v1672_v30  ;;  %v1663_v32 = vsub.f32 %v1446_v56, %v1647_v31 }
 0x3bc   :  { %v3586_v33 = vpop.eup %2823  ;;  %v1674_v34 = vmul.f32 1.442695, %v1663_v32 }
 0x3bd   :  { %v3588_v37 = vpop.eup %2825  ;;  %v1650_v38 = vpop.xlane.xlu1 %1649  ;;  %v1684_v40 = vsel %vm1267_vm2, %v3586_v33, 0.0 }
 0x3be   :  { %v1653_v39 = vpop.xlane.xlu0 %1652  ;;  %2829 = vpow2.f32 %v1674_v34  ;;  %v1664_v41 = vsub.f32 %v1492_v4, %v1650_v38  ;;  %1685 = vadd.xlane.f32.xlu1 %v1684_v40  ;;  %v1687_v45 = vsel %vm1267_vm2, %v3588_v37, 0.0 }
 0x3bf   :  { %v1665_v44 = vsub.f32 %v1538_v5, %v1653_v39  ;;  %1688 = vadd.xlane.f32.xlu0 %v1687_v45 }
 0x3c0   :  { %v1676_v47 = vmul.f32 1.442695, %v1664_v41 }
 0x3c1   :  { %v1678_v48 = vmul.f32 1.442695, %v1665_v44 }
 0x3c2   :  { %2831 = vpow2.f32 %v1676_v47 }
 0x3c3   :  { %2833 = vpow2.f32 %v1678_v48 }
 0x3c4   :  { %v3594_v49 = vpop.eup %2827 }
 0x3c5   :  { %v1656_v50 = vpop.xlane.xlu1 %1655  ;;  %v1659_v51 = vpop.xlane.xlu0 %1658  ;;  %v1690_v52 = vsel %vm1267_vm2, %v3594_v49, 0.0 }
 0x3c6   :  { %v1666_v53 = vsub.f32 %v1584_v8, %v1656_v50  ;;  %v1667_v54 = vsub.f32 %v1630_v14, %v1659_v51  ;;  %1691 = vadd.xlane.f32.xlu0 %v1690_v52 }
 0x3c8   :  { %v3598_v55 = vpop.eup %2829  ;;  %v1680_v56 = vmul.f32 1.442695, %v1666_v53  ;;  %v1682_v57 = vmul.f32 1.442695, %v1667_v54 }
 0x3c9   :  { %v986_v58 = vpop.permute.xlu1 %985  ;;  %v1693_v59 = vsel %vm1267_vm2, %v3598_v55, 0.0  ;;  %v988_v4 = vpop.permute.xlu0 %987 }
 0x3ca   :  { %2835 = vpow2.f32 %v1680_v56  ;;  %v993_v63 = vpack.i.b16 %v986_v58, %v3570_v42  ;;  %v996_v1 = vshrl.u32 %v986_v58, 16  ;;  %1694 = vadd.xlane.f32.xlu1 %v1693_v59  ;;  %v1003_v42 = vshrl.u32 %v988_v4, 16 }
 0x3cb   :  { %2837 = vpow2.f32 %v1682_v57 }
 0x3cc   :  { %v3604_v2 = vpop.eup %2831  ;;  %v997_v3 = vpack.i.b16 %v996_v1, %v995_v60  ;;  %v1007_v11 = vcombine.high %v993_v63, %v3452_v36  ;;  %v1014_v62 = vrot.slane %v993_v63, %v3454_v43 }
 0x3cd   :  { %v3606_v5 = vpop.eup %2833  ;;  %v990_v6 = vpop.permute.xlu1 %989  ;;  %v1696_v10 = vsel %vm1267_vm2, %v3604_v2, 0.0 }
 0x3ce   :  { %v1001_v12 = vpack.i.b16 %v990_v6, %v988_v4  ;;  %1697 = vadd.xlane.f32.xlu0 %v1696_v10  ;;  %v1073_v13 = vcombine.high %v997_v3, %v3452_v36  ;;  %v1004_v7 = vshrl.u32 %v990_v6, 16  ;;  %v1699_v61 = vsel %vm1267_vm2, %v3606_v5, 0.0 }
 0x3cf   :  { %1700 = vadd.xlane.f32.xlu1 %v1699_v61  ;;  %v1021_v16 = vrot.slane %v1007_v11, %v3454_v43  ;;  %v1080_v19 = vrot.slane %v997_v3, %v3454_v43 }
 0x3d0   :  { %v1022_v8 = vcombine.high %v1001_v12, %v3452_v36  ;;  %v1029_v14 = vrot.slane %v1001_v12, %v3454_v43  ;;  %v1005_v15 = vpack.i.b16 %v1004_v7, %v1003_v42  ;;  %v1087_v20 = vrot.slane %v1073_v13, %v3454_v43 }
 0x3d2   :  { %v1036_v17 = vrot.slane %v1022_v8, %v3454_v43  ;;  %v1037_v9 = vcombine.low %v1014_v62, %v1029_v14  ;;  %v1038_v18 = vcombine.high %v1014_v62, %v1029_v14  ;;  %v1088_v21 = vcombine.high %v1005_v15, %v3452_v36 }
 0x3d3   :  { %v1095_v22 = vrot.slane %v1005_v15, %v3454_v43 }
 0x3d4   :  { %v3623_v23 = vpop.eup %2835  ;;  %v1045_v24 = vrot.slane %v1037_v9, %v3457_v46  ;;  %v1052_v25 = vrot.slane %v1038_v18, %v3457_v46  ;;  %v1053_v26 = vcombine.low %v1021_v16, %v1036_v17  ;;  %v1054_v27 = vcombine.high %v1021_v16, %v1036_v17 }
 0x3d5   :  { %v1102_v28 = vrot.slane %v1088_v21, %v3454_v43  ;;  %v1103_v29 = vcombine.low %v1080_v19, %v1095_v22  ;;  %v1104_v30 = vcombine.high %v1080_v19, %v1095_v22  ;;  %v1702_v31 = vsel %vm1267_vm2, %v3623_v23, 0.0  ;;  %v3632_v39 = vpop.eup %2837 }
 0x3d6   :  { %v1061_v32 = vrot.slane %v1053_v26, %v3457_v46  ;;  %v1068_v36 = vrot.slane %v1054_v27, %v3457_v46  ;;  %v1139_v34 = vcombine.low %v1045_v24, %v1052_v25  ;;  %v2573_v38 = vcombine.high %v1045_v24, %v1052_v25  ;;  %1703 = vadd.xlane.f32.xlu0 %v1702_v31 }
 0x3d7   :  { %v1111_v40 = vrot.slane %v1103_v29, %v3457_v46  ;;  %v1118_v41 = vrot.slane %v1104_v30, %v3457_v46  ;;  %v1119_v44 = vcombine.low %v1087_v20, %v1102_v28  ;;  %v1120_v45 = vcombine.high %v1087_v20, %v1102_v28 }
 0x3d8   :  { %v1146_v47 = vrot.slane %v1139_v34, %v3454_v43  ;;  %v1154_v48 = vrot.slane %v2573_v38, %v3454_v43  ;;  %v1155_v50 = vcombine.low %v1061_v32, %v1068_v36  ;;  %v2574_v51 = vcombine.high %v1061_v32, %v1068_v36 }
 0x3d9   :  { %v1127_v52 = vrot.slane %v1119_v44, %v3457_v46  ;;  %v1134_v53 = vrot.slane %v1120_v45, %v3457_v46  ;;  %v1189_v54 = vcombine.low %v1111_v40, %v1118_v41  ;;  %v2575_v56 = vcombine.high %v1111_v40, %v1118_v41 }
 0x3da   :  { %v1162_v57 = vrot.slane %v1155_v50, %v3454_v43  ;;  %v1170_v58 = vrot.slane %v2574_v51, %v3454_v43  ;;  %v1705_v59 = vsel %vm1267_vm2, %v3632_v39, 0.0  ;;  %v1171_v60 = vcombine.low %v1146_v47, %v1154_v48 }
 0x3db   :  { %v1196_v63 = vrot.slane %v1189_v54, %v3454_v43  ;;  %v1204_v1 = vrot.slane %v2575_v56, %v3454_v43  ;;  %v1205_v3 = vcombine.low %v1127_v52, %v1134_v53  ;;  %v2576_v4 = vcombine.high %v1127_v52, %v1134_v53  ;;  %1706 = vadd.xlane.f32.xlu1 %v1705_v59 }
 0x3dc   :  { %v1179_v6 = vcombine.low %v1162_v57, %v1170_v58  ;;  %v1178_v13 = vrot.slane %v1171_v60, %v3457_v46 }
 0x3dd   :  { %v1212_v10 = vrot.slane %v1205_v3, %v3454_v43  ;;  %v1220_v11 = vrot.slane %v2576_v4, %v3454_v43  ;;  %v1221_v12 = vcombine.low %v1196_v63, %v1204_v1 }
 0x3de   :  { %v1186_v42 = vrot.slane %v1179_v6, %v3457_v46 }
 0x3df   :  { %v1229_v7 = vcombine.low %v1212_v10, %v1220_v11  ;;  %v1228_v8 = vrot.slane %v1221_v12, %v3457_v46 }
 0x3e0   :  { %v1187_v61 = vcombine.low %v1178_v13, %v1186_v42  ;;  %v1188_v62 = vcombine.high %v1178_v13, %v1186_v42 }
 0x3e1   :  { %v1236_v14 = vrot.slane %v1229_v7, %v3457_v46 }
 0x3e2   :  { %v1242_v17 = vshrl.u32 %v1187_v61, 16  ;;  %v1248_v21 = vshrl.u32 %v1188_v62, 16 }
 0x3e3   :  { %v1237_v15 = vcombine.low %v1228_v8, %v1236_v14  ;;  %v1238_v16 = vcombine.high %v1228_v8, %v1236_v14  ;;  %v2821_v14 = vld [vmem:[#allocation17] sm:$0xff]  }
 0x3e5   :  { %v1241_v9 = vpack.i.b16 %v1237_v15, %v1187_v61  ;;  %v1243_v18 = vshrl.u32 %v1237_v15, 16  ;;  %v1247_v19 = vpack.i.b16 %v1238_v16, %v1188_v62  ;;  %v1249_v20 = vshrl.u32 %v1238_v16, 16 }
 0x3e7   :  { %v2577_v22 = vcombine.low %v1241_v9, %v1241_v9  ;;  %v2578_v24 = vcombine.high %v1241_v9, %v1241_v9  ;;  %v1244_v25 = vpack.i.b16 %v1243_v18, %v1242_v17  ;;  %v2581_v26 = vcombine.low %v1247_v19, %v1247_v19 }
 0x3e8   :  { %v2582_v27 = vcombine.high %v1247_v19, %v1247_v19  ;;  %v1250_v28 = vpack.i.b16 %v1249_v20, %v1248_v21 }
 0x3e9   :  { %v1745_v29 = vsel %vm1743_vm3, %v2577_v22, 0  ;;  %v1791_v30 = vsel %vm1743_vm3, %v2578_v24, 0  ;;  %v2579_v31 = vcombine.low %v1244_v25, %v1244_v25  ;;  %v2580_v32 = vcombine.high %v1244_v25, %v1244_v25 }
 0x3ea   :  { %2730 = vmatpush3.bf16.msra.mxu1 %v1745_v29  ;;  %2736 = vmatpush3.bf16.msra.mxu0 %v1791_v30  ;;  %v1929_v36 = vsel %vm1743_vm3, %v2581_v26, 0  ;;  %v1975_v34 = vsel %vm1743_vm3, %v2582_v27, 0  ;;  %v2583_v38 = vcombine.low %v1250_v28, %v1250_v28  ;;  %v2584_v40 = vcombine.high %v1250_v28, %v1250_v28 }
 0x3eb   :  { %2741 = vmatprep.subr.bf16.mxu1 %v3170_v0  ;;  %2747 = vmatprep.subr.bf16.mxu0 %v3170_v0  ;;  %v1837_v41 = vsel %vm1743_vm3, %v2579_v31, 0  ;;  %v1883_v44 = vsel %vm1743_vm3, %v2580_v32, 0 }
 0x3ec   :  { %v2021_v45 = vsel %vm1743_vm3, %v2583_v38, 0  ;;  %v3662_v47 = vsel %vm1743_vm3, %v2584_v40, 0 }
 0x44b   :  { %v1686_v48 = vpop.xlane.xlu1 %1685 }
 0x44c   :  { %2839 = vrcp.f32 %v1686_v48  ;;  %v1689_v50 = vpop.xlane.xlu0 %1688 }
 0x44d   :  { %2841 = vrcp.f32 %v1689_v50 }
 0x453   :  { %v1692_v51 = vpop.xlane.xlu0 %1691 }
 0x454   :  { %2843 = vrcp.f32 %v1692_v51 }
 0x456   :  { %v2840_v52 = vpop.eup %2839 }
 0x457   :  { %v2842_v53 = vpop.eup %2841  ;;  %v1716_v54 = vmul.f32 %v2840_v52, %v3586_v33  ;;  %v1695_v56 = vpop.xlane.xlu1 %1694 }
 0x458   :  { %v1717_v57 = vmul.f32 %v2842_v53, %v3588_v37  ;;  %2845 = vrcp.f32 %v1695_v56 }
 0x459   :  { %1724 = vst.msk [vmem:[#allocation21] sm:$0xff] %vm1267_vm2, %v1716_v54  ;;  %v1732_v58 = vpack.c.bf16 %v1716_v54, %v1716_v54 }
 0x45a   :  { %1725 = vst.msk [vmem:[#allocation21 + $0x8] sm:$0xff] %vm1267_vm2, %v1717_v57  ;;  %v1733_v59 = vpack.c.bf16 %v1717_v57, %v1717_v57 }
 0x45b   :  { %2732 = vmatmul.mubr.msk.bf16.vlgmr.msra.gmra.mrb[20].mxu1 %vm1267_vm2, %v1732_v58  ;;  %v1698_v60 = vpop.xlane.xlu0 %1697 }
 0x45c   :  { %2738 = vmatmul.mubr.msk.bf16.vlgmr.msra.gmra.mrb[24].mxu0 %vm1267_vm2, %v1733_v59  ;;  %2742 = vmatpush3.bf16.msra.mxu1 %v1837_v41  ;;  %2847 = vrcp.f32 %v1698_v60  ;;  %v1701_v63 = vpop.xlane.xlu1 %1700 }
 0x45d   :  { %2748 = vmatpush3.bf16.msra.mxu0 %v1883_v44  ;;  %2743 = vmatprep.mubr.msk.bf16.mxu1 %vm3171_vm0, %v3170_v0  ;;  %2849 = vrcp.f32 %v1701_v63 }
 0x45e   :  { %v2844_v33 = vpop.eup %2843  ;;  %2753 = vmatprep.subr.bf16.mxu1 %v3170_v0  ;;  %2749 = vmatprep.mubr.msk.bf16.mxu0 %vm3171_vm0, %v3170_v0 }
 0x45f   :  { %v1718_v37 = vmul.f32 %v2844_v33, %v3594_v49  ;;  %2759 = vmatprep.subr.bf16.mxu0 %v3170_v0 }
 0x461   :  { %1726 = vst.msk [vmem:[#allocation21 + $0x10] sm:$0xff] %vm1267_vm2, %v1718_v37  ;;  %v1734_v1 = vpack.c.bf16 %v1718_v37, %v1718_v37 }
 0x462   :  { %v2846_v3 = vpop.eup %2845 }
 0x463   :  { %v1719_v4 = vmul.f32 %v2846_v3, %v3598_v55  ;;  %2744 = vmatmul.mubr.msk.bf16.vlgmr.msra.gmra.mrb[24].mxu1 %vm1267_vm2, %v1734_v1  ;;  %v1704_v6 = vpop.xlane.xlu0 %1703 }
 0x464   :  { %2754 = vmatpush3.bf16.msra.mxu1 %v1929_v36  ;;  %2851 = vrcp.f32 %v1704_v6  ;;  %2755 = vmatprep.mubr.msk.bf16.mxu1 %vm3171_vm0, %v3170_v0 }
 0x465   :  { %1727 = vst.msk [vmem:[#allocation21 + $0x18] sm:$0xff] %vm1267_vm2, %v1719_v4  ;;  %v1735_v10 = vpack.c.bf16 %v1719_v4, %v1719_v4  ;;  %2765 = vmatprep.subr.bf16.mxu1 %v3170_v0 }
 0x466   :  { %v2848_v49 = vpop.eup %2847 }
 0x467   :  { %v1720_v11 = vmul.f32 %v2848_v49, %v3604_v2  ;;  %2750 = vmatmul.mubr.msk.bf16.vlgmr.msra.gmra.mrb[28].mxu0 %vm1267_vm2, %v1735_v10  ;;  %v2850_v12 = vpop.eup %2849 }
 0x468   :  { %v1707_v55 = vpop.xlane.xlu1 %1706  ;;  %2760 = vmatpush3.bf16.msra.mxu0 %v1975_v34  ;;  %2761 = vmatprep.mubr.msk.bf16.mxu0 %vm3171_vm0, %v3170_v0  ;;  %v1721_v13 = vmul.f32 %v2850_v12, %v3606_v5 }
 0x469   :  { %1728 = vst.msk [vmem:[#allocation21 + $0x20] sm:$0xff] %vm1267_vm2, %v1720_v11  ;;  %2853 = vrcp.f32 %v1707_v55  ;;  %v1736_v42 = vpack.c.bf16 %v1720_v11, %v1720_v11  ;;  %2771 = vmatprep.subr.bf16.mxu0 %v3170_v0 }
 0x46a   :  { %1729 = vst.msk [vmem:[#allocation21 + $0x28] sm:$0xff] %vm1267_vm2, %v1721_v13  ;;  %v1737_v2 = vpack.c.bf16 %v1721_v13, %v1721_v13 }
 0x46b   :  { %2756 = vmatmul.mubr.msk.bf16.vlgmr.msra.gmra.mrb[28].mxu1 %vm1267_vm2, %v1736_v42 }
 0x46c   :  { %2766 = vmatpush3.bf16.msra.mxu1 %v2021_v45  ;;  %2767 = vmatprep.mubr.msk.bf16.mxu1 %vm3171_vm0, %v3170_v0 }
 0x46d   :  { %2777 = vmatprep.subr.bf16.mxu1 %v3170_v0 }
 0x46e   :  { %v2852_v7 = vpop.eup %2851 }
 0x46f   :  { %v1722_v5 = vmul.f32 %v2852_v7, %v3623_v23  ;;  %2762 = vmatmul.mubr.msk.bf16.vlgmr.msra.gmra.mrb[32].mxu0 %vm1267_vm2, %v1737_v2 }
 0x470   :  { %2772 = vmatpush3.bf16.msra.mxu0 %v3662_v47  ;;  %2773 = vmatprep.mubr.msk.bf16.mxu0 %vm3171_vm0, %v3170_v0 }
 0x471   :  { %1730 = vst.msk [vmem:[#allocation21 + $0x30] sm:$0xff] %vm1267_vm2, %v1722_v5  ;;  %v1738_v61 = vpack.c.bf16 %v1722_v5, %v1722_v5 }
 0x473   :  { %v2854_v62 = vpop.eup %2853  ;;  %2768 = vmatmul.mubr.msk.bf16.vlgmr.msra.gmra.mrb[32].mxu1 %vm1267_vm2, %v1738_v61 }
 0x474   :  { %v1723_v8 = vmul.f32 %v2854_v62, %v3632_v39  ;;  %2781 = vmatprep.mubr.msk.bf16.mxu1 %vm3171_vm0, %v3170_v0  ;;  %2778 = vmatpush3.bf16.msra.mxu1 %v2821_v14 }
 0x475   :  { %2779 = vmatprep.subr.bf16.mxu1 %v3170_v0 }
 0x476   :  { %1731 = vst.msk [vmem:[#allocation21 + $0x38] sm:$0xff] %vm1267_vm2, %v1723_v8  ;;  %v1739_v23 = vpack.c.bf16 %v1723_v8, %v1723_v8 }
 0x478   :  { %2774 = vmatmul.mubr.msk.bf16.vlgmr.msra.gmra.mrb[36].mxu0 %vm1267_vm2, %v1739_v23 }
 0x52e   :  { %v1781_v15 = vpop.f32.mrb[20].mxu1 }
 0x52f   :  { %v1827_v16 = vpop.f32.mrb[24].mxu0  ;;  %v2733_v17 = vpop.f32.mrb[21].mxu1  ;;  %v2109_v21 = vpack.c.bf16 %v1781_v15, %v1781_v15 }
 0x530   :  { %v2739_v9 = vpop.f32.mrb[25].mxu0  ;;  %v1784_v18 = vpop.f32.mrb[22].mxu1  ;;  %v2110_v28 = vpack.c.bf16 %v1827_v16, %v1827_v16 }
 0x531   :  { %v1830_v19 = vpop.f32.mrb[26].mxu0  ;;  %v2734_v20 = vpop.f32.mrb[23].mxu1  ;;  %v2120_v27 = vshrl.u32 %v2109_v21, 16 }
 0x532   :  { %v2740_v39 = vpop.f32.mrb[27].mxu0  ;;  %v2132_v40 = vshrl.u32 %v2110_v28, 16 }
 0x536   :  { %v1873_v22 = vpop.f32.mrb[24].mxu1 }
 0x537   :  { %v2111_v24 = vpack.c.bf16 %v1873_v22, %v1873_v22  ;;  %v2745_v25 = vpop.f32.mrb[25].mxu1 }
 0x538   :  { %v1876_v26 = vpop.f32.mrb[26].mxu1 }
 0x539   :  { %v2119_v29 = vpack.i.b16 %v2111_v24, %v2109_v21  ;;  %v2121_v30 = vshrl.u32 %v2111_v24, 16  ;;  %v2746_v31 = vpop.f32.mrb[27].mxu1 }
 0x53a   :  { %v1919_v32 = vpop.f32.mrb[28].mxu0 }
 0x53b   :  { %v2122_v0 = vpack.i.b16 %v2121_v30, %v2120_v27  ;;  %v2112_v36 = vpack.c.bf16 %v1919_v32, %v1919_v32  ;;  %v2751_v34 = vpop.f32.mrb[29].mxu0  ;;  %v2148_v10 = vrot.slane %v2119_v29, %v3454_v43 }
 0x53c   :  { %v1922_v38 = vpop.f32.mrb[30].mxu0 }
 0x53d   :  { %v2131_v41 = vpack.i.b16 %v2112_v36, %v2110_v28  ;;  %v2133_v44 = vshrl.u32 %v2112_v36, 16  ;;  %v2752_v45 = vpop.f32.mrb[31].mxu0  ;;  %v2182_v42 = vrot.slane %v2122_v0, %v3454_v43 }
 0x53e   :  { %v1965_v47 = vpop.f32.mrb[28].mxu1 }
 0x53f   :  { %v2134_v48 = vpack.i.b16 %v2133_v44, %v2132_v40  ;;  %v2757_v50 = vpop.f32.mrb[29].mxu1  ;;  %v2113_v57 = vpack.c.bf16 %v1965_v47, %v1965_v47  ;;  %v2216_v18 = vrot.slane %v2131_v41, %v3454_v43 }
 0x540   :  { %v1968_v51 = vpop.f32.mrb[30].mxu1 }
 0x541   :  { %v2758_v52 = vpop.f32.mrb[31].mxu1  ;;  %v2126_v37 = vshrl.u32 %v2113_v57, 16  ;;  %v2250_v25 = vrot.slane %v2134_v48, %v3454_v43 }
 0x542   :  { %v2011_v53 = vpop.f32.mrb[32].mxu0 }
 0x543   :  { %v2763_v54 = vpop.f32.mrb[33].mxu0  ;;  %v2114_v6 = vpack.c.bf16 %v2011_v53, %v2011_v53 }
 0x544   :  { %v2014_v56 = vpop.f32.mrb[34].mxu0 }
 0x545   :  { %v2764_v58 = vpop.f32.mrb[35].mxu0  ;;  %v2138_v62 = vshrl.u32 %v2114_v6, 16 }
 0x546   :  { %v2057_v59 = vpop.f32.mrb[32].mxu1 }
 0x547   :  { %v2115_v60 = vpack.c.bf16 %v2057_v59, %v2057_v59  ;;  %v2769_v63 = vpop.f32.mrb[33].mxu1 }
 0x548   :  { %v2060_v33 = vpop.f32.mrb[34].mxu1 }
 0x549   :  { %v2125_v1 = vpack.i.b16 %v2115_v60, %v2113_v57  ;;  %v2127_v3 = vshrl.u32 %v2115_v60, 16  ;;  %v2770_v4 = vpop.f32.mrb[35].mxu1 }
 0x54b   :  { %v2128_v49 = vpack.i.b16 %v2127_v3, %v2126_v37  ;;  %v2156_v11 = vrot.slane %v2125_v1, %v3454_v43  ;;  %v2103_v12 = vpop.f32.mrb[36].mxu0  ;;  %v2822_v37 = vld [vmem:[#allocation17 + $0x8] sm:$0xff]  }
 0x54c   :  { %v2116_v55 = vpack.c.bf16 %v2103_v12, %v2103_v12  ;;  %v2775_v13 = vpop.f32.mrb[37].mxu0  ;;  %2780 = vmatpush3.bf16.msra.mxu1 %v2822_v37 }
 0x54d   :  { %v2157_v2 = vcombine.low %v2148_v10, %v2156_v11  ;;  %v2158_v7 = vcombine.high %v2148_v10, %v2156_v11  ;;  %v2190_v5 = vrot.slane %v2128_v49, %v3454_v43  ;;  %v2106_v61 = vpop.f32.mrb[38].mxu0 }
 0x54e   :  { %v2137_v8 = vpack.i.b16 %v2116_v55, %v2114_v6  ;;  %v2139_v23 = vshrl.u32 %v2116_v55, 16  ;;  %v2776_v14 = vpop.f32.mrb[39].mxu0 }
 0x54f   :  { %v2165_v15 = vrot.slane %v2157_v2, %v3457_v46  ;;  %v2172_v16 = vrot.slane %v2158_v7, %v3457_v46  ;;  %v2191_v17 = vcombine.low %v2182_v42, %v2190_v5  ;;  %v2192_v9 = vcombine.high %v2182_v42, %v2190_v5 }
 0x550   :  { %v2140_v19 = vpack.i.b16 %v2139_v23, %v2138_v62  ;;  %v2224_v20 = vrot.slane %v2137_v8, %v3454_v43 }
 0x551   :  { %v2199_v39 = vrot.slane %v2191_v17, %v3457_v46  ;;  %v2206_v21 = vrot.slane %v2192_v9, %v3457_v46  ;;  %v2277_v22 = vcombine.low %v2165_v15, %v2172_v16  ;;  %v2601_v24 = vcombine.high %v2165_v15, %v2172_v16 }
 0x552   :  { %v2225_v26 = vcombine.low %v2216_v18, %v2224_v20  ;;  %v2226_v27 = vcombine.high %v2216_v18, %v2224_v20  ;;  %v2258_v28 = vrot.slane %v2140_v19, %v3454_v43 }
 0x553   :  { %v2284_v29 = vrot.slane %v2277_v22, %v3454_v43  ;;  %v2292_v30 = vrot.slane %v2601_v24, %v3454_v43  ;;  %v2302_v31 = vcombine.low %v2199_v39, %v2206_v21  ;;  %v2602_v32 = vcombine.high %v2199_v39, %v2206_v21 }
 0x554   :  { %v2233_v0 = vrot.slane %v2225_v26, %v3457_v46  ;;  %v2240_v36 = vrot.slane %v2226_v27, %v3457_v46  ;;  %v2259_v34 = vcombine.low %v2250_v25, %v2258_v28  ;;  %v2260_v38 = vcombine.high %v2250_v25, %v2258_v28 }
 0x555   :  { %v2309_v40 = vrot.slane %v2302_v31, %v3454_v43  ;;  %v2317_v41 = vrot.slane %v2602_v32, %v3454_v43  ;;  %v2293_v44 = vcombine.low %v2284_v29, %v2292_v30 }
 0x556   :  { %v2267_v45 = vrot.slane %v2259_v34, %v3457_v46  ;;  %v2274_v47 = vrot.slane %v2260_v38, %v3457_v46  ;;  %v2327_v48 = vcombine.low %v2233_v0, %v2240_v36  ;;  %v2603_v50 = vcombine.high %v2233_v0, %v2240_v36 }
 0x557   :  { %v2300_v51 = vrot.slane %v2293_v44, %v3457_v46  ;;  %v2318_v52 = vcombine.low %v2309_v40, %v2317_v41 }
 0x558   :  { %v2334_v53 = vrot.slane %v2327_v48, %v3454_v43  ;;  %v2342_v54 = vrot.slane %v2603_v50, %v3454_v43  ;;  %v2352_v56 = vcombine.low %v2267_v45, %v2274_v47  ;;  %v2604_v57 = vcombine.high %v2267_v45, %v2274_v47 }
 0x559   :  { %v2325_v58 = vrot.slane %v2318_v52, %v3457_v46  ;;  %v2301_v59 = vcombine.high %v2300_v51, %v3177_v35  ;;  %v2380_v1 = vshrl.u32 %v2300_v51, 16 }
 0x55a   :  { %v2359_v60 = vrot.slane %v2352_v56, %v3454_v43  ;;  %v2367_v63 = vrot.slane %v2604_v57, %v3454_v43  ;;  %v2343_v33 = vcombine.low %v2334_v53, %v2342_v54 }
 0x55b   :  { %v2381_v3 = vshrl.u32 %v2325_v58, 16  ;;  %v2326_v4 = vcombine.high %v2325_v58, %v3177_v35  ;;  %v2379_v6 = vpack.i.b16 %v2325_v58, %v2300_v51  ;;  %v2386_v55 = vshrl.u32 %v2301_v59, 16 }
 0x55c   :  { %v2350_v10 = vrot.slane %v2343_v33, %v3457_v46  ;;  %v2368_v49 = vcombine.low %v2359_v60, %v2367_v63 }
 0x55d   :  { %v2382_v11 = vpack.i.b16 %v2381_v3, %v2380_v1  ;;  %v2385_v12 = vpack.i.b16 %v2326_v4, %v2301_v59  ;;  %v2387_v13 = vshrl.u32 %v2326_v4, 16 }
 0x55e   :  { %v2375_v42 = vrot.slane %v2368_v49, %v3457_v46  ;;  %v2351_v2 = vcombine.high %v2350_v10, %v3177_v35  ;;  %v2392_v7 = vshrl.u32 %v2350_v10, 16 }
 0x55f   :  { %v2388_v43 = vpack.i.b16 %v2387_v13, %v2386_v55 }
 0x560   :  { %v2393_v5 = vshrl.u32 %v2375_v42, 16  ;;  %v2376_v61 = vcombine.high %v2375_v42, %v3177_v35  ;;  %v2391_v62 = vpack.i.b16 %v2375_v42, %v2350_v10  ;;  %v2398_v8 = vshrl.u32 %v2351_v2, 16 }
 0x562   :  { %v2394_v23 = vpack.i.b16 %v2393_v5, %v2392_v7  ;;  %v2397_v14 = vpack.i.b16 %v2376_v61, %v2351_v2  ;;  %v2399_v15 = vshrl.u32 %v2376_v61, 16  ;;  %v2605_v16 = vcombine.low %v2379_v6, %v2391_v62 }
 0x564   :  { %v2606_v17 = vcombine.low %v2382_v11, %v2394_v23  ;;  %v2607_v9 = vcombine.low %v2385_v12, %v2397_v14  ;;  %v2400_v18 = vpack.i.b16 %v2399_v15, %v2398_v8 }
 0x566   :  { %2407 = vrot.lane.b32.xlu0 %v2606_v17, %s3178_s23  ;;  %2412 = vrot.lane.b32.xlu1 %v2607_v9, %s3179_s13  ;;  %v2608_v46 = vcombine.low %v2388_v43, %v2400_v18 }
 0x56a   :  { %2417 = vrot.lane.b32.xlu1 %v2608_v46, %s3180_s17 }
 0x5d8   :  { %v2408_v19 = vpop.permute.xlu0 %2407  ;;  %v2413_v20 = vpop.permute.xlu1 %2412 }
 0x5d9   :  { %v2421_v35 = vsel %vm1267_vm2, %v2605_v16, %v2408_v19 }
 0x5da   :  { %v2424_v39 = vsel %vm2422_vm4, %v2421_v35, %v2413_v20 }
 0x5dc   :  { %v2418_v21 = vpop.permute.xlu1 %2417 }
 0x5dd   :  { %v2427_v22 = vsel %vm2425_vm5, %v2424_v39, %v2418_v21 }
 0x5de   :  { %2782 = vmatmul.mubr.msk.bf16.vlgmr.msra.gmra.mrb[36].mxu1 %vm214_vm1, %v2427_v22 }
 0x5df   :  { %3108 = shalt.err (!%p3105_p8)
}
 0x5e0   :  { %s3109_s9 = scalar_lea.hbm %s3784_s12, 1024 }
 0x5e1   :  { %p3110_p9 = scmp.ne.s32.totalorder %s3784_s12, %s3109_s9  ;;  %p3113_p10 = scmp.lt.u32.totalorder %s3109_s9, %s3784_s12 }
 0x5e3   :  { %p3115_p11 = pnand %p3113_p10, %p3110_p9 }
 0x5e5   :  { %3118 = shalt.err (!%p3115_p11)
}
 0x5e6   :  { %s3182_s15 = smov 128   ;;  %v2609_v24 = vld [vmem:[#allocation19] ss:$0 sm:$0xff]  ;;  %s3183_s24 = smov [#allocation20]  }
 0x5e7   :  { %2519 = dma.vmem_to_hbm [thread:$0]  %s2514_s5, 1024, %s3784_s12, [#allocation22], %s3182_s15, %s3182_s15, %s3178_s23  }
 0x5e8   :  { %s2501_s28 = sshll.u32 %s3183_s24, 4  ;;  %s2502_s28 = int_to_ptr.vmem [resolvable:$true] %s2501_s28 }
 0x5e9   :  { %s3119_s1 = scalar_lea.vmem %s2502_s28, 256  ;;  %p3124_p13 = scmp.lt.s32.totalorder %s2502_s28, %s2502_s28 }
 0x5ea   :  { %p3120_p12 = scmp.ne.s32.totalorder %s2502_s28, %s3119_s1  ;;  %p3125_p0 = scmp.lt.s32.totalorder %s3119_s1, %s3119_s1 }
 0x5ec   :  { %p3126_p1 = por %p3125_p0, %p3124_p13 }
 0x5ee   :  { %p3127_p2 = pnand %p3126_p1, %p3120_p12 }
 0x6b1   :  { %v2487_v25 = vpop.f32.mrb[36].mxu1 }
 0x6b2   :  { %v2488_v26 = vadd.f32 %v2609_v24, %v2487_v25  ;;  %v2783_v27 = vpop.f32.mrb[37].mxu1 }
 0x6b3   :  { %v2490_v28 = vpop.f32.mrb[38].mxu1 }
 0x6b4   :  { %2494 = vst.msk [vmem:[#allocation20] sm:$0xff] %vm214_vm1, %v2488_v26  ;;  %v2491_v29 = vadd.f32 %v2609_v24, %v2490_v28  ;;  %v2784_v30 = vpop.f32.mrb[39].mxu1 }
 0x6b6   :  { %2495 = vst.msk [vmem:[#allocation20 + $0x8] sm:$0xff] %vm214_vm1, %v2491_v29 }
 0x6b7   :  { %3130 = shalt.err (!%p3127_p2)
}
 0x6b8   :  { %s3131_s14 = scalar_lea.hbm %s3783_s11, 256 }
 0x6b9   :  { %p3132_p3 = scmp.ne.s32.totalorder %s3783_s11, %s3131_s14  ;;  %p3135_p4 = scmp.lt.u32.totalorder %s3131_s14, %s3783_s11 }
 0x6bb   :  { %p3137_p5 = pnand %p3135_p4, %p3132_p3 }
 0x6bd   :  { %3140 = shalt.err (!%p3137_p5)
}
 0x6be   :  { %2507 = dma.vmem_to_hbm [thread:$0]  %s2502_s28, 256, %s3783_s11, [#allocation4], %s3182_s15, %s3182_s15, %s3178_s23  }
 0x6bf   :  { %3153 = dma.done.wait [#allocation4], 256  }
 0x6c0   :  { %3154 = vsyncadd [#allocation4], 4294967040 }
 0x6c1   :  { %3155 = dma.done.wait [#allocation22], 1024  }
 0x6c2   :  { %3156 = vsyncadd [#allocation22], 4294966272 }
 0x6c3   :  { %2526 = vsyncpa [#allocation3], 1 }
 0x6c4   :  { %2527 = vsyncpa [#allocation6], 1 }
 0x6c5   :  { %2528 = vsyncpa [#allocation9], 1 }
 0x6c6   :  { %2529 = vsyncpa [#allocation12], 1 }
 0x6c7   :  { %2530 = vsyncpa [#allocation15], 1 }
 0x6c8   :  { %2531 = vsyncpa [#allocation18], 1 }
 0x6c9   :  { %2532 = vsyncpa [#allocation4], 1 }
 0x6ca   :  { %2533 = vsyncpa [#allocation22], 1 }

</bundles_post_ra>
